<compile_context>
chip_gen: v7x
topology: tpu7x:2x2x1
jax: 0.10.0
libtpu: 0.0.40
codegen_flags: <defaults>
</compile_context>

<pallas_src>
import jax
import jax.numpy as jnp
from jax.experimental import pallas as pl
from jax.experimental.pallas import tpu as pltpu


# ----------------------------------------------------------------------------
# Fused kernel: conv3x3 + bias + ReLU + maxpool2x2 + aux classifier, per image.
# ----------------------------------------------------------------------------
def _local_fused_kernel(x_ref, me_ref, mo_ref, cb_ref, se_ref, so_ref, ravg_ref,
                        w1_ref, b1_ref, w2_ref, b2_ref, head_ref, logits_ref):
    # x_ref   : (1, Hp, Wp*Cin)       padded NHWC rows of one image
    # me/mo   : (KH, Wp*Cin, W2*Cout) unfolded conv weights (even / odd output cols)
    # cb_ref  : (1, W2*Cout)          conv bias tiled over w2
    # se/so   : (H2, H)               0/1 selectors of even / odd conv rows
    # ravg_ref: (W2*Cout, Cout)       adaptive-avg-pool reduction (includes 1/(H2*W2))
    # w1,b1,w2,b2 : classifier params
    xp = x_ref[0]                                   # (Hp, Wp*Cin)
    kh_taps = me_ref.shape[0]
    h_out = se_ref.shape[1]                         # H (conv output rows)
    n_lanes = me_ref.shape[2]                       # W2*Cout

    acc_e = jnp.zeros((h_out, n_lanes), jnp.float32)
    acc_o = jnp.zeros((h_out, n_lanes), jnp.float32)
    for kh in range(kh_taps):                       # unrolled (3 taps)
        rows = xp[kh:kh + h_out, :]                 # shifted row block (H, Wp*Cin)
        acc_e = acc_e + jnp.dot(rows, me_ref[kh], preferred_element_type=jnp.float32)
        acc_o = acc_o + jnp.dot(rows, mo_ref[kh], preferred_element_type=jnp.float32)

    bias = cb_ref[...]
    relu_e = jnp.maximum(acc_e + bias, 0.0)         # conv+bias+ReLU at even w
    relu_o = jnp.maximum(acc_o + bias, 0.0)         # conv+bias+ReLU at odd  w
    pool_w = jnp.maximum(relu_e, relu_o)            # (H, W2*Cout): W-direction pool

    # H-direction pool: exact 0/1 row selections (MXU) + elementwise max (VPU).
    rows_e = jnp.dot(se_ref[...], pool_w, preferred_element_type=jnp.float32)
    rows_o = jnp.dot(so_ref[...], pool_w, preferred_element_type=jnp.float32)
    head = jnp.maximum(rows_e, rows_o)              # (H2, W2*Cout) == NHWC slab
    head_ref[0] = head.astype(head_ref.dtype)       # lane-dense store (last dim 256)

    # AuxClassifier: AdaptiveAvgPool2d((1,1)) -> Flatten -> Linear -> ReLU -> Linear
    col_sum = jnp.sum(head, axis=0, keepdims=True)                       # (1, W2*Cout)
    pooled = jnp.dot(col_sum, ravg_ref[...], preferred_element_type=jnp.float32)  # (1, Cout)
    h1 = jnp.maximum(
        jnp.dot(pooled, w1_ref[...], preferred_element_type=jnp.float32) + b1_ref[...], 0.0)
    logits = jnp.dot(h1, w2_ref[...], preferred_element_type=jnp.float32) + b2_ref[...]
    logits_ref[0] = logits.astype(logits_ref.dtype)


# ----------------------------------------------------------------------------
# One-time weight-side preparation (no dependence on batch / input values).
# ----------------------------------------------------------------------------
def prepare_kernel_params(params, H, W):
    cw = params["conv_w"].astype(jnp.float32)       # (Cout, Cin, 3, 3)
    Cout, Cin, KH, KW = cw.shape
    assert KH == 3 and KW == 3, "head conv is 3x3 / pad=1"
    assert H % 2 == 0 and W % 2 == 0
    Hp, Wp = H + 2, W + 2
    H2, W2 = H // 2, W // 2

    w_t = cw.transpose(2, 3, 1, 0)                  # (KH, KW, Cin, Cout)
    wp = jnp.arange(Wp)[:, None]
    w2 = jnp.arange(W2)[None, :]
    m_even, m_odd = [], []
    for kh in range(KH):
        me = jnp.zeros((Wp * Cin, W2 * Cout), jnp.float32)
        mo = jnp.zeros((Wp * Cin, W2 * Cout), jnp.float32)
        for kw in range(KW):
            pe = (wp == 2 * w2 + kw).astype(jnp.float32)          # (Wp, W2)
            po = (wp == 2 * w2 + 1 + kw).astype(jnp.float32)
            me = me + jnp.kron(pe, w_t[kh, kw])                   # (Wp*Cin, W2*Cout)
            mo = mo + jnp.kron(po, w_t[kh, kw])
        m_even.append(me)
        m_odd.append(mo)

    h_idx = jnp.arange(H)[None, :]
    h2_idx = jnp.arange(H2)[:, None]
    return {
        "m_even": jnp.stack(m_even),                               # (KH, Wp*Cin, W2*Cout)
        "m_odd": jnp.stack(m_odd),
        "conv_b_row": jnp.tile(params["conv_b"].astype(jnp.float32), (W2,)).reshape(1, W2 * Cout),
        "sel_h_even": (h_idx == 2 * h2_idx).astype(jnp.float32),   # (H2, H)
        "sel_h_odd": (h_idx == 2 * h2_idx + 1).astype(jnp.float32),
        "r_avg": jnp.tile(jnp.eye(Cout, dtype=jnp.float32), (W2, 1)) / float(H2 * W2),
        "fc1_w": params["fc1_w"].astype(jnp.float32),
        "fc1_b": params["fc1_b"].reshape(1, -1).astype(jnp.float32),
        "fc2_w": params["fc2_w"].astype(jnp.float32),
        "fc2_b": params["fc2_b"].reshape(1, -1).astype(jnp.float32),
    }


# ----------------------------------------------------------------------------
# Wrapper: single fused pallas_call returning both head activations and logits.
# ----------------------------------------------------------------------------
def local_apply(x, kp):
    """x: (N, Cin, H, W) NCHW.  Returns (head NHWC (N, H/2, W/2, Cout), logits (N, num_class))."""
    N, Cin, H, W = x.shape
    KH, WpCin, n_lanes = kp["m_even"].shape
    Cout = kp["r_avg"].shape[1]
    H2, W2 = H // 2, W // 2
    num_class = kp["fc2_w"].shape[1]
    Hp, Wp = H + 2, W + 2
    assert WpCin == Wp * Cin and n_lanes == W2 * Cout

    # Tiny input-side glue: spatial pad + lay out as padded-NHWC row blocks
    # x_rows[n, hp, wp*Cin + ci] = xpad[n, ci, hp, wp]
    xpad = jnp.pad(x, ((0, 0), (0, 0), (1, 1), (1, 1)))
    x_rows = xpad.transpose(0, 2, 3, 1).reshape(N, Hp, Wp * Cin)

    head_flat, logits3 = pl.pallas_call(
        _local_fused_kernel,
        out_shape=(
            jax.ShapeDtypeStruct((N, H2, W2 * Cout), jnp.float32),
            jax.ShapeDtypeStruct((N, 1, num_class), jnp.float32),
        ),
        grid_spec=pltpu.PrefetchScalarGridSpec(
            num_scalar_prefetch=0,
            grid=(N,),
            in_specs=[
                pl.BlockSpec((1, Hp, Wp * Cin), lambda n: (n, 0, 0)),
                pl.BlockSpec((KH, Wp * Cin, W2 * Cout), lambda n: (0, 0, 0)),
                pl.BlockSpec((KH, Wp * Cin, W2 * Cout), lambda n: (0, 0, 0)),
                pl.BlockSpec((1, W2 * Cout), lambda n: (0, 0)),
                pl.BlockSpec((H2, H), lambda n: (0, 0)),
                pl.BlockSpec((H2, H), lambda n: (0, 0)),
                pl.BlockSpec((W2 * Cout, Cout), lambda n: (0, 0)),
                pl.BlockSpec(kp["fc1_w"].shape, lambda n: (0, 0)),
                pl.BlockSpec(kp["fc1_b"].shape, lambda n: (0, 0)),
                pl.BlockSpec(kp["fc2_w"].shape, lambda n: (0, 0)),
                pl.BlockSpec(kp["fc2_b"].shape, lambda n: (0, 0)),
            ],
            out_specs=[
                pl.BlockSpec((1, H2, W2 * Cout), lambda n: (n, 0, 0)),
                pl.BlockSpec((1, 1, num_class), lambda n: (n, 0, 0)),
            ],
        ),
        compiler_params=pltpu.CompilerParams(dimension_semantics=("parallel",)),
    )(x_rows, kp["m_even"], kp["m_odd"], kp["conv_b_row"],
      kp["sel_h_even"], kp["sel_h_odd"], kp["r_avg"],
      kp["fc1_w"], kp["fc1_b"], kp["fc2_w"], kp["fc2_b"])

    head_nhwc = head_flat.reshape(N, H2, W2, Cout)   # free contiguous reshape
    return head_nhwc, logits3.reshape(N, num_class)


def local_forward(x, kp):
    """Local.forward(x) == self.head(x): NHWC activations (N, H/2, W/2, Cout)."""
    head, _ = local_apply(x, kp)
    return head


def local_local_forward(x, kp):
    """Local.local_forward(x): AuxClassifier(head(x)) -> (N, num_class) logits."""
    _, logits = local_apply(x, kp)
    return logits


# ----------------------------------------------------------------------------
# Params + pure-JAX reference
# ----------------------------------------------------------------------------
def init_params(key, cin=3, cout=16, hidden=128, num_class=10):
    k1, k2, k3, k4 = jax.random.split(key, 4)
    return {
        "conv_w": 0.1 * jax.random.normal(k1, (cout, cin, 3, 3), jnp.float32),
        "conv_b": 0.01 * jax.random.normal(k4, (cout,), jnp.float32),
        "fc1_w": 0.1 * jax.random.normal(k2, (cout, hidden), jnp.float32),
        "fc1_b": 0.01 * jax.random.normal(k3, (hidden,), jnp.float32),
        "fc2_w": 0.1 * jax.random.normal(k4, (hidden, num_class), jnp.float32),
        "fc2_b": jnp.zeros((num_class,), jnp.float32),
    }


def reference_forward(x, params):
    y = jax.lax.conv_general_dilated(
        x, params["conv_w"], window_strides=(1, 1), padding=((1, 1), (1, 1)),
        dimension_numbers=("NCHW", "OIHW", "NCHW"))
    y = jnp.maximum(y + params["conv_b"][None, :, None, None], 0.0)
    N, C, H, W = y.shape
    head = y.reshape(N, C, H // 2, 2, W // 2, 2).max(axis=(3, 5))    # NCHW pooled
    pooled = head.mean(axis=(2, 3))                                   # (N, C)
    h1 = jnp.maximum(pooled @ params["fc1_w"] + params["fc1_b"], 0.0)
    logits = h1 @ params["fc2_w"] + params["fc2_b"]
    return head, logits


if __name__ == "__main__":
    key = jax.random.PRNGKey(0)
    pkey, xkey = jax.random.split(key)
    params = init_params(pkey)

    # Local.get_act_size probes with (1, 3, 32, 32); use the module's natural small shape.
    x = jax.random.normal(xkey, (2, 3, 32, 32), jnp.float32)

    kparams = prepare_kernel_params(params, H=32, W=32)   # one-time weight unfolding

    head_nhwc, logits = jax.block_until_ready(jax.jit(local_apply)(x, kparams))

    assert head_nhwc.shape == (2, 16, 16, 16), head_nhwc.shape   # NHWC head activations
    assert logits.shape == (2, 10), logits.shape

    # Correctness vs pure-JAX reference (NCHW).
    ref_head, ref_logits = reference_forward(x, params)
    head_nchw = head_nhwc.transpose(0, 3, 1, 2)
    assert jnp.allclose(head_nchw, ref_head, atol=3e-2, rtol=3e-2), \
        float(jnp.max(jnp.abs(head_nchw - ref_head)))
    assert jnp.allclose(logits, ref_logits, atol=3e-2, rtol=3e-2), \
        float(jnp.max(jnp.abs(logits - ref_logits)))
    assert bool(jnp.all(jnp.isfinite(head_nhwc))) and bool(jnp.all(jnp.isfinite(logits)))

    print("KERNEL_OK")
</pallas_src>

<mosaic_0001>
module attributes {stable_mosaic.version = 11 : i64} {
  func.func @_local_fused_kernel(%arg0: i32, %arg1: memref<1x34x102xf32, #tpu.memory_space<vmem>>, %arg2: memref<3x102x256xf32, #tpu.memory_space<vmem>>, %arg3: memref<3x102x256xf32, #tpu.memory_space<vmem>>, %arg4: memref<1x256xf32, #tpu.memory_space<vmem>>, %arg5: memref<16x32xf32, #tpu.memory_space<vmem>>, %arg6: memref<16x32xf32, #tpu.memory_space<vmem>>, %arg7: memref<256x16xf32, #tpu.memory_space<vmem>>, %arg8: memref<16x128xf32, #tpu.memory_space<vmem>>, %arg9: memref<1x128xf32, #tpu.memory_space<vmem>>, %arg10: memref<128x10xf32, #tpu.memory_space<vmem>>, %arg11: memref<1x10xf32, #tpu.memory_space<vmem>>, %arg12: memref<1x16x256xf32, #tpu.memory_space<vmem>>, %arg13: memref<1x1x10xf32, #tpu.memory_space<vmem>>) attributes {dimension_semantics = [#tpu.dimension_semantics<parallel>], iteration_bounds = array<i64: 2>, scalar_prefetch = 0 : i64, scratch_operands = 0 : i64, tpu.core_type = #tpu.core_type<tc>, window_params = [{transform_indices = @transform_0, window_bounds = array<i64: 1, 34, 102>}, {pipeline_mode = #tpu.pipeline_mode<synchronous>, transform_indices = @transform_1, window_bounds = array<i64: 3, 102, 256>}, {pipeline_mode = #tpu.pipeline_mode<synchronous>, transform_indices = @transform_2, window_bounds = array<i64: 3, 102, 256>}, {pipeline_mode = #tpu.pipeline_mode<synchronous>, transform_indices = @transform_3, window_bounds = array<i64: 1, 256>}, {pipeline_mode = #tpu.pipeline_mode<synchronous>, transform_indices = @transform_4, window_bounds = array<i64: 16, 32>}, {pipeline_mode = #tpu.pipeline_mode<synchronous>, transform_indices = @transform_5, window_bounds = array<i64: 16, 32>}, {pipeline_mode = #tpu.pipeline_mode<synchronous>, transform_indices = @transform_6, window_bounds = array<i64: 256, 16>}, {pipeline_mode = #tpu.pipeline_mode<synchronous>, transform_indices = @transform_7, window_bounds = array<i64: 16, 128>}, {pipeline_mode = #tpu.pipeline_mode<synchronous>, transform_indices = @transform_8, window_bounds = array<i64: 1, 128>}, {pipeline_mode = #tpu.pipeline_mode<synchronous>, transform_indices = @transform_9, window_bounds = array<i64: 128, 10>}, {pipeline_mode = #tpu.pipeline_mode<synchronous>, transform_indices = @transform_10, window_bounds = array<i64: 1, 10>}, {transform_indices = @transform_11, window_bounds = array<i64: 1, 16, 256>}, {transform_indices = @transform_12, window_bounds = array<i64: 1, 1, 10>}]} {
    %c0 = arith.constant 0 : index
    %c0_0 = arith.constant 0 : index
    %c0_1 = arith.constant 0 : index
    %0 = vector.load %arg1[%c0, %c0_0, %c0_1] : memref<1x34x102xf32, #tpu.memory_space<vmem>>, vector<1x34x102xf32>
    %1 = vector.shape_cast %0 : vector<1x34x102xf32> to vector<34x102xf32>
    %cst = arith.constant 0.000000e+00 : f32
    %2 = vector.broadcast %cst : f32 to vector<32x256xf32>
    %cst_2 = arith.constant 0.000000e+00 : f32
    %3 = vector.broadcast %cst_2 : f32 to vector<32x256xf32>
    %4 = vector.extract_strided_slice %1 {offsets = [0, 0], sizes = [32, 102], strides = [1, 1]} : vector<34x102xf32> to vector<32x102xf32>
    %c0_3 = arith.constant 0 : index
    %c0_4 = arith.constant 0 : index
    %c0_5 = arith.constant 0 : index
    %5 = vector.load %arg2[%c0_3, %c0_4, %c0_5] : memref<3x102x256xf32, #tpu.memory_space<vmem>>, vector<1x102x256xf32>
    %6 = vector.shape_cast %5 : vector<1x102x256xf32> to vector<102x256xf32>
    %cst_6 = arith.constant dense<0.000000e+00> : vector<32x256xf32>
    %7 = tpu.matmul %4, %6, %cst_6 {dimension_numbers = #tpu.dot_dimension_numbers<[1], [0], [0], [1], [0, 0, 1, 1], [], []>} : vector<32x102xf32>, vector<102x256xf32>, vector<32x256xf32> -> vector<32x256xf32>
    %8 = arith.addf %2, %7 : vector<32x256xf32>
    %c0_7 = arith.constant 0 : index
    %c0_8 = arith.constant 0 : index
    %c0_9 = arith.constant 0 : index
    %9 = vector.load %arg3[%c0_7, %c0_8, %c0_9] : memref<3x102x256xf32, #tpu.memory_space<vmem>>, vector<1x102x256xf32>
    %10 = vector.shape_cast %9 : vector<1x102x256xf32> to vector<102x256xf32>
    %cst_10 = arith.constant dense<0.000000e+00> : vector<32x256xf32>
    %11 = tpu.matmul %4, %10, %cst_10 {dimension_numbers = #tpu.dot_dimension_numbers<[1], [0], [0], [1], [0, 0, 1, 1], [], []>} : vector<32x102xf32>, vector<102x256xf32>, vector<32x256xf32> -> vector<32x256xf32>
    %12 = arith.addf %3, %11 : vector<32x256xf32>
    %13 = vector.extract_strided_slice %1 {offsets = [1, 0], sizes = [32, 102], strides = [1, 1]} : vector<34x102xf32> to vector<32x102xf32>
    %c1 = arith.constant 1 : index
    %c0_11 = arith.constant 0 : index
    %c0_12 = arith.constant 0 : index
    %14 = vector.load %arg2[%c1, %c0_11, %c0_12] : memref<3x102x256xf32, #tpu.memory_space<vmem>>, vector<1x102x256xf32>
    %15 = vector.shape_cast %14 : vector<1x102x256xf32> to vector<102x256xf32>
    %cst_13 = arith.constant dense<0.000000e+00> : vector<32x256xf32>
    %16 = tpu.matmul %13, %15, %cst_13 {dimension_numbers = #tpu.dot_dimension_numbers<[1], [0], [0], [1], [0, 0, 1, 1], [], []>} : vector<32x102xf32>, vector<102x256xf32>, vector<32x256xf32> -> vector<32x256xf32>
    %17 = arith.addf %8, %16 : vector<32x256xf32>
    %c1_14 = arith.constant 1 : index
    %c0_15 = arith.constant 0 : index
    %c0_16 = arith.constant 0 : index
    %18 = vector.load %arg3[%c1_14, %c0_15, %c0_16] : memref<3x102x256xf32, #tpu.memory_space<vmem>>, vector<1x102x256xf32>
    %19 = vector.shape_cast %18 : vector<1x102x256xf32> to vector<102x256xf32>
    %cst_17 = arith.constant dense<0.000000e+00> : vector<32x256xf32>
    %20 = tpu.matmul %13, %19, %cst_17 {dimension_numbers = #tpu.dot_dimension_numbers<[1], [0], [0], [1], [0, 0, 1, 1], [], []>} : vector<32x102xf32>, vector<102x256xf32>, vector<32x256xf32> -> vector<32x256xf32>
    %21 = arith.addf %12, %20 : vector<32x256xf32>
    %22 = vector.extract_strided_slice %1 {offsets = [2, 0], sizes = [32, 102], strides = [1, 1]} : vector<34x102xf32> to vector<32x102xf32>
    %c2 = arith.constant 2 : index
    %c0_18 = arith.constant 0 : index
    %c0_19 = arith.constant 0 : index
    %23 = vector.load %arg2[%c2, %c0_18, %c0_19] : memref<3x102x256xf32, #tpu.memory_space<vmem>>, vector<1x102x256xf32>
    %24 = vector.shape_cast %23 : vector<1x102x256xf32> to vector<102x256xf32>
    %cst_20 = arith.constant dense<0.000000e+00> : vector<32x256xf32>
    %25 = tpu.matmul %22, %24, %cst_20 {dimension_numbers = #tpu.dot_dimension_numbers<[1], [0], [0], [1], [0, 0, 1, 1], [], []>} : vector<32x102xf32>, vector<102x256xf32>, vector<32x256xf32> -> vector<32x256xf32>
    %26 = arith.addf %17, %25 : vector<32x256xf32>
    %c2_21 = arith.constant 2 : index
    %c0_22 = arith.constant 0 : index
    %c0_23 = arith.constant 0 : index
    %27 = vector.load %arg3[%c2_21, %c0_22, %c0_23] : memref<3x102x256xf32, #tpu.memory_space<vmem>>, vector<1x102x256xf32>
    %28 = vector.shape_cast %27 : vector<1x102x256xf32> to vector<102x256xf32>
    %cst_24 = arith.constant dense<0.000000e+00> : vector<32x256xf32>
    %29 = tpu.matmul %22, %28, %cst_24 {dimension_numbers = #tpu.dot_dimension_numbers<[1], [0], [0], [1], [0, 0, 1, 1], [], []>} : vector<32x102xf32>, vector<102x256xf32>, vector<32x256xf32> -> vector<32x256xf32>
    %30 = arith.addf %21, %29 : vector<32x256xf32>
    %c0_25 = arith.constant 0 : index
    %c0_26 = arith.constant 0 : index
    %31 = vector.load %arg4[%c0_25, %c0_26] : memref<1x256xf32, #tpu.memory_space<vmem>>, vector<1x256xf32>
    %32 = vector.broadcast %31 : vector<1x256xf32> to vector<32x256xf32>
    %33 = arith.addf %26, %32 : vector<32x256xf32>
    %cst_27 = arith.constant 0.000000e+00 : f32
    %34 = vector.broadcast %cst_27 : f32 to vector<32x256xf32>
    %35 = arith.maximumf %33, %34 : vector<32x256xf32>
    %36 = vector.broadcast %31 : vector<1x256xf32> to vector<32x256xf32>
    %37 = arith.addf %30, %36 : vector<32x256xf32>
    %cst_28 = arith.constant 0.000000e+00 : f32
    %38 = vector.broadcast %cst_28 : f32 to vector<32x256xf32>
    %39 = arith.maximumf %37, %38 : vector<32x256xf32>
    %40 = arith.maximumf %35, %39 : vector<32x256xf32>
    %c0_29 = arith.constant 0 : index
    %c0_30 = arith.constant 0 : index
    %41 = vector.load %arg5[%c0_29, %c0_30] : memref<16x32xf32, #tpu.memory_space<vmem>>, vector<16x32xf32>
    %cst_31 = arith.constant dense<0.000000e+00> : vector<16x256xf32>
    %42 = tpu.matmul %41, %40, %cst_31 {dimension_numbers = #tpu.dot_dimension_numbers<[1], [0], [0], [1], [0, 0, 1, 1], [], []>} : vector<16x32xf32>, vector<32x256xf32>, vector<16x256xf32> -> vector<16x256xf32>
    %c0_32 = arith.constant 0 : index
    %c0_33 = arith.constant 0 : index
    %43 = vector.load %arg6[%c0_32, %c0_33] : memref<16x32xf32, #tpu.memory_space<vmem>>, vector<16x32xf32>
    %cst_34 = arith.constant dense<0.000000e+00> : vector<16x256xf32>
    %44 = tpu.matmul %43, %40, %cst_34 {dimension_numbers = #tpu.dot_dimension_numbers<[1], [0], [0], [1], [0, 0, 1, 1], [], []>} : vector<16x32xf32>, vector<32x256xf32>, vector<16x256xf32> -> vector<16x256xf32>
    %45 = arith.maximumf %42, %44 : vector<16x256xf32>
    %c0_35 = arith.constant 0 : index
    %c0_36 = arith.constant 0 : index
    %c0_37 = arith.constant 0 : index
    %46 = vector.load %arg12[%c0_35, %c0_36, %c0_37] : memref<1x16x256xf32, #tpu.memory_space<vmem>>, vector<1x16x256xf32>
    %47 = vector.shape_cast %46 : vector<1x16x256xf32> to vector<16x256xf32>
    %48 = vector.shape_cast %45 : vector<16x256xf32> to vector<1x16x256xf32>
    tpu.vector_store %arg12[%c0_35, %c0_36, %c0_37], %48 {strides = array<i32>} : memref<1x16x256xf32, #tpu.memory_space<vmem>>, vector<1x16x256xf32>,
    %cst_38 = arith.constant dense<0.000000e+00> : vector<256xf32>
    %49 = vector.multi_reduction <add>, %45, %cst_38 [0] : vector<16x256xf32> to vector<256xf32>
    %50 = vector.shape_cast %49 : vector<256xf32> to vector<1x256xf32>
    %c0_39 = arith.constant 0 : index
    %c0_40 = arith.constant 0 : index
    %51 = vector.load %arg7[%c0_39, %c0_40] : memref<256x16xf32, #tpu.memory_space<vmem>>, vector<256x16xf32>
    %cst_41 = arith.constant dense<0.000000e+00> : vector<1x16xf32>
    %52 = tpu.matmul %50, %51, %cst_41 {dimension_numbers = #tpu.dot_dimension_numbers<[1], [0], [0], [1], [0, 0, 1, 1], [], []>} : vector<1x256xf32>, vector<256x16xf32>, vector<1x16xf32> -> vector<1x16xf32>
    %c0_42 = arith.constant 0 : index
    %c0_43 = arith.constant 0 : index
    %53 = vector.load %arg8[%c0_42, %c0_43] : memref<16x128xf32, #tpu.memory_space<vmem>>, vector<16x128xf32>
    %cst_44 = arith.constant dense<0.000000e+00> : vector<1x128xf32>
    %54 = tpu.matmul %52, %53, %cst_44 {dimension_numbers = #tpu.dot_dimension_numbers<[1], [0], [0], [1], [0, 0, 1, 1], [], []>} : vector<1x16xf32>, vector<16x128xf32>, vector<1x128xf32> -> vector<1x128xf32>
    %c0_45 = arith.constant 0 : index
    %c0_46 = arith.constant 0 : index
    %55 = vector.load %arg9[%c0_45, %c0_46] : memref<1x128xf32, #tpu.memory_space<vmem>>, vector<1x128xf32>
    %56 = arith.addf %54, %55 : vector<1x128xf32>
    %cst_47 = arith.constant 0.000000e+00 : f32
    %57 = vector.broadcast %cst_47 : f32 to vector<1x128xf32>
    %58 = arith.maximumf %56, %57 : vector<1x128xf32>
    %c0_48 = arith.constant 0 : index
    %c0_49 = arith.constant 0 : index
    %59 = vector.load %arg10[%c0_48, %c0_49] : memref<128x10xf32, #tpu.memory_space<vmem>>, vector<128x10xf32>
    %cst_50 = arith.constant dense<0.000000e+00> : vector<1x10xf32>
    %60 = tpu.matmul %58, %59, %cst_50 {dimension_numbers = #tpu.dot_dimension_numbers<[1], [0], [0], [1], [0, 0, 1, 1], [], []>} : vector<1x128xf32>, vector<128x10xf32>, vector<1x10xf32> -> vector<1x10xf32>
    %c0_51 = arith.constant 0 : index
    %c0_52 = arith.constant 0 : index
    %61 = vector.load %arg11[%c0_51, %c0_52] : memref<1x10xf32, #tpu.memory_space<vmem>>, vector<1x10xf32>
    %62 = arith.addf %60, %61 : vector<1x10xf32>
    %c0_53 = arith.constant 0 : index
    %c0_54 = arith.constant 0 : index
    %c0_55 = arith.constant 0 : index
    %63 = vector.load %arg13[%c0_53, %c0_54, %c0_55] : memref<1x1x10xf32, #tpu.memory_space<vmem>>, vector<1x1x10xf32>
    %64 = vector.shape_cast %63 : vector<1x1x10xf32> to vector<1x10xf32>
    %65 = vector.shape_cast %62 : vector<1x10xf32> to vector<1x1x10xf32>
    tpu.vector_store %arg13[%c0_53, %c0_54, %c0_55], %65 {strides = array<i32>} : memref<1x1x10xf32, #tpu.memory_space<vmem>>, vector<1x1x10xf32>,
    return
  }
  func.func @transform_0(%arg0: i32) -> (i32, i32, i32) {
    %c0_i32 = arith.constant 0 : i32
    %c0_i32_0 = arith.constant 0 : i32
    %c0_i32_1 = arith.constant 0 : i32
    return %arg0, %c0_i32, %c0_i32_0 : i32, i32, i32
  }
  func.func @transform_1(%arg0: i32) -> (i32, i32, i32) {
    %c0_i32 = arith.constant 0 : i32
    %c0_i32_0 = arith.constant 0 : i32
    %c0_i32_1 = arith.constant 0 : i32
    %c0_i32_2 = arith.constant 0 : i32
    return %c0_i32, %c0_i32_0, %c0_i32_1 : i32, i32, i32
  }
  func.func @transform_2(%arg0: i32) -> (i32, i32, i32) {
    %c0_i32 = arith.constant 0 : i32
    %c0_i32_0 = arith.constant 0 : i32
    %c0_i32_1 = arith.constant 0 : i32
    %c0_i32_2 = arith.constant 0 : i32
    return %c0_i32, %c0_i32_0, %c0_i32_1 : i32, i32, i32
  }
  func.func @transform_3(%arg0: i32) -> (i32, i32) {
    %c0_i32 = arith.constant 0 : i32
    %c0_i32_0 = arith.constant 0 : i32
    %c0_i32_1 = arith.constant 0 : i32
    return %c0_i32, %c0_i32_0 : i32, i32
  }
  func.func @transform_4(%arg0: i32) -> (i32, i32) {
    %c0_i32 = arith.constant 0 : i32
    %c0_i32_0 = arith.constant 0 : i32
    %c0_i32_1 = arith.constant 0 : i32
    return %c0_i32, %c0_i32_0 : i32, i32
  }
  func.func @transform_5(%arg0: i32) -> (i32, i32) {
    %c0_i32 = arith.constant 0 : i32
    %c0_i32_0 = arith.constant 0 : i32
    %c0_i32_1 = arith.constant 0 : i32
    return %c0_i32, %c0_i32_0 : i32, i32
  }
  func.func @transform_6(%arg0: i32) -> (i32, i32) {
    %c0_i32 = arith.constant 0 : i32
    %c0_i32_0 = arith.constant 0 : i32
    %c0_i32_1 = arith.constant 0 : i32
    return %c0_i32, %c0_i32_0 : i32, i32
  }
  func.func @transform_7(%arg0: i32) -> (i32, i32) {
    %c0_i32 = arith.constant 0 : i32
    %c0_i32_0 = arith.constant 0 : i32
    %c0_i32_1 = arith.constant 0 : i32
    return %c0_i32, %c0_i32_0 : i32, i32
  }
  func.func @transform_8(%arg0: i32) -> (i32, i32) {
    %c0_i32 = arith.constant 0 : i32
    %c0_i32_0 = arith.constant 0 : i32
    %c0_i32_1 = arith.constant 0 : i32
    return %c0_i32, %c0_i32_0 : i32, i32
  }
  func.func @transform_9(%arg0: i32) -> (i32, i32) {
    %c0_i32 = arith.constant 0 : i32
    %c0_i32_0 = arith.constant 0 : i32
    %c0_i32_1 = arith.constant 0 : i32
    return %c0_i32, %c0_i32_0 : i32, i32
  }
  func.func @transform_10(%arg0: i32) -> (i32, i32) {
    %c0_i32 = arith.constant 0 : i32
    %c0_i32_0 = arith.constant 0 : i32
    %c0_i32_1 = arith.constant 0 : i32
    return %c0_i32, %c0_i32_0 : i32, i32
  }
  func.func @transform_11(%arg0: i32) -> (i32, i32, i32) {
    %c0_i32 = arith.constant 0 : i32
    %c0_i32_0 = arith.constant 0 : i32
    %c0_i32_1 = arith.constant 0 : i32
    return %arg0, %c0_i32, %c0_i32_0 : i32, i32, i32
  }
  func.func @transform_12(%arg0: i32) -> (i32, i32, i32) {
    %c0_i32 = arith.constant 0 : i32
    %c0_i32_0 = arith.constant 0 : i32
    %c0_i32_1 = arith.constant 0 : i32
    return %arg0, %c0_i32, %c0_i32_0 : i32, i32, i32
  }
}

</mosaic_0001>

<bundles_post_ra>
// kernel: local_apply.1
= control target key start
LH: loop header
LB: loop body
LE: loop exit
PB: predicated region body
PF: predicated region fallthrough
CT: control target
= control target key end

     0   :  { %s3381_s0 = inlined_call_operand.vmem [shape: f32[2,34,102], index: 0, kind: input, shape index: {}]   ;;  %s3382_s1 = inlined_call_operand.vmem [shape: f32[3,102,256], index: 1, kind: input, shape index: {}]   ;;  %s3383_s2 = inlined_call_operand.vmem [shape: f32[3,102,256], index: 2, kind: input, shape index: {}]   ;;  %s3384_s3 = inlined_call_operand.vmem [shape: f32[1,256], index: 3, kind: input, shape index: {}]   ;;  %s3385_s4 = inlined_call_operand.vmem [shape: f32[16,32], index: 4, kind: input, shape index: {}]   ;;  %s3386_s5 = inlined_call_operand.vmem [shape: f32[16,32], index: 5, kind: input, shape index: {}]   ;;  %s3387_s6 = inlined_call_operand.vmem [shape: f32[256,16], index: 6, kind: input, shape index: {}]   ;;  %s3388_s7 = inlined_call_operand.vmem [shape: f32[16,128], index: 7, kind: input, shape index: {}]   ;;  %s3389_s8 = inlined_call_operand.vmem [shape: f32[1,128], index: 8, kind: input, shape index: {}]   ;;  %s3390_s9 = inlined_call_operand.vmem [shape: f32[128,10], index: 9, kind: input, shape index: {}]   ;;  %s3391_s10 = inlined_call_operand.vmem [shape: f32[1,10], index: 10, kind: input, shape index: {}]   ;;  %s3392_s11 = inlined_call_operand.vmem [shape: f32[2,16,256], index: 11, kind: output, shape index: {0}]   ;;  %s3393_s12 = inlined_call_operand.hbm [shape: f32[2,1,10], index: 12, kind: output, shape index: {1}]  }
   0x1   :  { %3398 = sst [smem:[#allocation9_spill]] %s3381_s0 }
   0x2   :  { %18 = vsyncpa [#allocation3], 0 }
   0x3   :  { %20 = vsyncpa [#allocation3 + $0x1], 0  ;;  %s2520_s21 = smov 0   ;;  %s2522_s22 = smov 0  }
   0x4   :  { %s2524_s23 = smov 0   ;;  %s2526_s24 = smov 0  }
   0x5 LB: > { %3399 = sst [smem:[#allocation5_spill]] %s2445_s23  ;;  %s2541_s25 = sadd.s32 4294967295, %s2449_s24   ;;  %s2449_s24 = sphi %s2526_s24, %s3407_s24   ;;  %s2445_s23 = sphi %s2524_s23, %s3409_s23   ;;  %s2441_s22 = sphi %s2522_s22, %s3411_s22   ;;  %s2437_s21 = sphi %s2520_s21, %s3410_s21  }
   0x6   : > { %s1840_s26 = sadd.s32 4294967294, %s2449_s24   ;;  %s2545_s27 = sadd.s32 1, %s2449_s24  }
   0x7   : > { %3400 = sst [smem:[#allocation6_spill]] %s2545_s27  ;;  %s295_s28 = sadd.s32 1, %s2445_s23 }
   0x8   : > { %s292_s29 = ssub.s32 %s2449_s24, %s2545_s27  ;;  %p305_p0 = scmp.ne.s32.totalorder %s2445_s23, %s2441_s22 }
   0x9   : > { %p293_p1 = scmp.eq.s32.totalorder %s292_s29, 0  ;;  %p306_p2 = scmp.eq.s32.totalorder %s2541_s25, 1 }
   0xa   : > { %p311_p3 = scmp.ne.s32.totalorder %s2441_s22, %s2437_s21  ;;  %p312_p4 = scmp.eq.s32.totalorder %s1840_s26, 1 }
   0xb   : > { %s2556_s30 = scalar_select %p293_p1, %s2445_s23, %s295_s28  }
   0xc   : > { %p2558_p5 = por %p306_p2, %p305_p0  ;;  %p2562_p6 = por %p312_p4, %p311_p3 }
   0xd   : > { %3401 = sst [smem:[#allocation7_spill]] %s2556_s30  ;;  %p1843_p7 = scmp.ge.s32.totalorder %s2449_s24, 1 }
   0xe   : > { %s3403_s14 = scalar_select %p2562_p6, 1, 0 }
   0xf   : > { %p368_p8 = scmp.lt.s32.totalorder %s2449_s24, 3 }
  0x10   : > { %3404 = sst [smem:[#allocation8_spill]] %s3403_s14 }
  0x11   : > { %p369_p9 = pnand %p1843_p7, %p368_p8 }
  0x12   : > { %v1848_v0 = vld [vmem:[%s3382_s1 + $0xd8] sm:$0xff] (!%p369_p9)  ;;  %v1850_v1 = vld [vmem:[%s3382_s1 + $0xe8] sm:$0xff] (!%p369_p9)  ;;  %v1847_v5 = vld [vmem:[%s3382_s1 + $0xd0] sm:$0xff] (!%p369_p9)  ;;  %v2451_v7 = vmov (!%p369_p9), 0.0   ;;  %p414_p10 = scmp.lt.s32.totalorder (!%p369_p9), %s2541_s25, 1  ;;  %s3405_s0 = sld [smem:[#allocation9_spill]] (!%p369_p9) }
  0x13   : > { %372 = sbr.rel (%p369_p9) target bundleno = 1232 (0x4d0), region = 64  ;;  %v1886_v2 = vld [vmem:[%s3383_s2 + $0xd8] sm:$0xff] (!%p369_p9)  ;;  %v2093_v3 = vpack.c.bf16 (!%p369_p9), %v1850_v1, %v1848_v0  ;;  %v1888_v4 = vld [vmem:[%s3383_s2 + $0xe8] sm:$0xff] (!%p369_p9)  ;;  %v1849_v6 = vld [vmem:[%s3382_s1 + $0xe0] sm:$0xff] (!%p369_p9)  ;;  %603 = vmatprep.mubr.f32.mxu0 (!%p369_p9), %v2451_v7  ;;  %828 = vmatprep.mubr.f32.mxu1 (!%p369_p9), %v2451_v7  ;;  %vm532_vm0 = vcmask (!%p369_p9), 1045504   ;;  %vm513_vm1 = vcmask (!%p369_p9), 1046528  }
  0x14   : > { %v2141_v8 = vpack.c.bf16 (!%p369_p9), %v1888_v4, %v1886_v2  ;;  %v2095_v9 = vpack.c.bf16 (!%p369_p9), %v1849_v6, %v1847_v5  ;;  %v1885_v10 = vld [vmem:[%s3383_s2 + $0xd0] sm:$0xff] (!%p369_p9)  ;;  %v1887_v11 = vld [vmem:[%s3383_s2 + $0xe0] sm:$0xff] (!%p369_p9)  ;;  %v1852_v12 = vld [vmem:[%s3382_s1 + $0xf8] sm:$0xff] (!%p369_p9)  ;;  %vm523_vm2 = vcmask (!%p369_p9), 834560   ;;  %vm1279_vm3 = vcmask (!%p369_p9), 261120  }
  0x15   : > { %2094 = vmatprep.subr.bf16.mxu0 (!%p369_p9), %v2093_v3  ;;  %v2143_v13 = vpack.c.bf16 (!%p369_p9), %v1887_v11, %v1885_v10  ;;  %v1854_v14 = vld [vmem:[%s3382_s1 + $0x108] sm:$0xff] (!%p369_p9)  ;;  %v1890_v15 = vld [vmem:[%s3383_s2 + $0xf8] sm:$0xff] (!%p369_p9)  ;;  %v1851_v19 = vld [vmem:[%s3382_s1 + $0xf0] sm:$0xff] (!%p369_p9)  ;;  %vm2453_vm4 = vmmov (!%p369_p9), 0   ;;  %vm1575_vm5 = vcmask (!%p369_p9), 130048   ;;  %vm1737_vm6 = vcmask (!%p369_p9), 73728  }
  0x16   : > { %v1892_v16 = vld [vmem:[%s3383_s2 + $0x108] sm:$0xff] (!%p369_p9)  ;;  %2142 = vmatprep.subr.bf16.mxu1 (!%p369_p9), %v2141_v8  ;;  %2096 = vmatpush1.bf16.msra.mxu0 (!%p369_p9), %v2095_v9  ;;  %v2097_v17 = vpack.c.bf16 (!%p369_p9), %v1854_v14, %v1852_v12  ;;  %v1853_v20 = vld [vmem:[%s3382_s1 + $0x100] sm:$0xff] (!%p369_p9)  ;;  %v1889_v21 = vld [vmem:[%s3383_s2 + $0xf0] sm:$0xff] (!%p369_p9) }
  0x17   : > { %v2145_v18 = vpack.c.bf16 (!%p369_p9), %v1892_v16, %v1890_v15  ;;  %2144 = vmatpush1.bf16.msra.mxu1 (!%p369_p9), %v2143_v13  ;;  %v2099_v22 = vpack.c.bf16 (!%p369_p9), %v1853_v20, %v1851_v19  ;;  %v1891_v23 = vld [vmem:[%s3383_s2 + $0x100] sm:$0xff] (!%p369_p9)  ;;  %v1856_v24 = vld [vmem:[%s3382_s1 + $0x118] sm:$0xff] (!%p369_p9)  ;;  %v1858_v25 = vld [vmem:[%s3382_s1 + $0x128] sm:$0xff] (!%p369_p9) }
  0x18   : > { %2098 = vmatprep.subr.bf16.mxu0 (!%p369_p9), %v2097_v17  ;;  %v2147_v26 = vpack.c.bf16 (!%p369_p9), %v1891_v23, %v1889_v21  ;;  %v2101_v27 = vpack.c.bf16 (!%p369_p9), %v1858_v25, %v1856_v24  ;;  %v1894_v28 = vld [vmem:[%s3383_s2 + $0x118] sm:$0xff] (!%p369_p9)  ;;  %v1896_v29 = vld [vmem:[%s3383_s2 + $0x128] sm:$0xff] (!%p369_p9)  ;;  %v1855_v30 = vld [vmem:[%s3382_s1 + $0x110] sm:$0xff] (!%p369_p9) }
  0x19   : > { %2146 = vmatprep.subr.bf16.mxu1 (!%p369_p9), %v2145_v18  ;;  %v2149_v31 = vpack.c.bf16 (!%p369_p9), %v1896_v29, %v1894_v28  ;;  %v1857_v32 = vld [vmem:[%s3382_s1 + $0x120] sm:$0xff] (!%p369_p9)  ;;  %v1893_v33 = vld [vmem:[%s3383_s2 + $0x110] sm:$0xff] (!%p369_p9)  ;;  %v1860_v36 = vld [vmem:[%s3382_s1 + $0x138] sm:$0xff] (!%p369_p9) }
  0x1a   : > { %v1895_v34 = vld [vmem:[%s3383_s2 + $0x120] sm:$0xff]  ;;  %2100 = vmatpush1.bf16.msra.mxu0 %v2099_v22  ;;  %v2103_v35 = vpack.c.bf16 %v1857_v32, %v1855_v30  ;;  %v1862_v37 = vld [vmem:[%s3382_s1 + $0x148] sm:$0xff]  ;;  %v1898_v38 = vld [vmem:[%s3383_s2 + $0x138] sm:$0xff]  ;;  %s2664_s30 = scalar_select %p414_p10, %s2541_s25, 1 }
  0x1b   : > { %2148 = vmatpush1.bf16.msra.mxu1 %v2147_v26  ;;  %2102 = vmatprep.subr.bf16.mxu0 %v2101_v27  ;;  %v2151_v39 = vpack.c.bf16 %v1895_v34, %v1893_v33  ;;  %v2105_v40 = vpack.c.bf16 %v1862_v37, %v1860_v36  ;;  %v1900_v41 = vld [vmem:[%s3383_s2 + $0x148] sm:$0xff]  ;;  %v1859_v42 = vld [vmem:[%s3382_s1 + $0x130] sm:$0xff]  ;;  %v1861_v43 = vld [vmem:[%s3382_s1 + $0x140] sm:$0xff] }
  0x1c   : > { %2150 = vmatprep.subr.bf16.mxu1 %v2149_v31  ;;  %v2153_v44 = vpack.c.bf16 %v1900_v41, %v1898_v38  ;;  %v1897_v45 = vld [vmem:[%s3383_s2 + $0x130] sm:$0xff]  ;;  %v1899_v46 = vld [vmem:[%s3383_s2 + $0x140] sm:$0xff]  ;;  %v1864_v47 = vld [vmem:[%s3382_s1 + $0x158] sm:$0xff]  ;;  %v2107_v51 = vpack.c.bf16 %v1861_v43, %v1859_v42  ;;  %s2344_s27 = smul.u32 40, %s2664_s30 }
  0x1d   : > { %v1866_v48 = vld [vmem:[%s3382_s1 + $0x168] sm:$0xff]  ;;  %v1902_v49 = vld [vmem:[%s3383_s2 + $0x158] sm:$0xff]  ;;  %v2155_v52 = vpack.c.bf16 %v1899_v46, %v1897_v45  ;;  %v1863_v54 = vld [vmem:[%s3382_s1 + $0x150] sm:$0xff] }
  0x1e   : > { %v1904_v50 = vld [vmem:[%s3383_s2 + $0x168] sm:$0xff]  ;;  %2104 = vmatpush1.bf16.msra.mxu0 %v2103_v35  ;;  %v2109_v53 = vpack.c.bf16 %v1866_v48, %v1864_v47  ;;  %v1865_v55 = vld [vmem:[%s3382_s1 + $0x160] sm:$0xff]  ;;  %v1901_v56 = vld [vmem:[%s3383_s2 + $0x150] sm:$0xff]  ;;  %s2718_s28 = scalar_lea.vmem %s3405_s0, %s2344_s27  ;;  %s1995_s0 = sshll.u32 %s2664_s30, 5 }
  0x1f   : > { %2152 = vmatpush1.bf16.msra.mxu1 %v2151_v39  ;;  %2106 = vmatprep.subr.bf16.mxu0 %v2105_v40  ;;  %v2157_v57 = vpack.c.bf16 %v1904_v50, %v1902_v49  ;;  %v1903_v58 = vld [vmem:[%s3383_s2 + $0x160] sm:$0xff]  ;;  %v1868_v59 = vld [vmem:[%s3382_s1 + $0x178] sm:$0xff]  ;;  %v1870_v60 = vld [vmem:[%s3382_s1 + $0x188] sm:$0xff]  ;;  %v2111_v63 = vpack.c.bf16 %v1865_v55, %v1863_v54  ;;  %s423_s17 = scalar_lea.vmem %s3392_s11, %s1995_s0  ;;  %s412_s0 = sand.u32 1, %s2441_s22  }
  0x20   : > { %2154 = vmatprep.subr.bf16.mxu1 %v2153_v44  ;;  %v1906_v61 = vld [vmem:[%s3383_s2 + $0x178] sm:$0xff]  ;;  %v1908_v62 = vld [vmem:[%s3383_s2 + $0x188] sm:$0xff]  ;;  %v2159_v0 = vpack.c.bf16 %v1903_v58, %v1901_v56  ;;  %v2113_v1 = vpack.c.bf16 %v1870_v60, %v1868_v59  ;;  %v1867_v2 = vld [vmem:[%s3382_s1 + $0x170] sm:$0xff]  ;;  %s413_s30 = scalar_lea.vmem [#allocation2], %s412_s0  ;;  %s1745_s23 = scalar_lea.sflag [#allocation3], %s412_s0 }
  0x21   : > { %v1869_v3 = vld [vmem:[%s3382_s1 + $0x180] sm:$0xff]  ;;  %v2161_v4 = vpack.c.bf16 %v1908_v62, %v1906_v61  ;;  %v1905_v5 = vld [vmem:[%s3383_s2 + $0x170] sm:$0xff]  ;;  %v2730_v10 = vld [vmem:[%s2718_s28 + $0x8] sm:$0xff]  ;;  %s1760_s27 = sshll.u32 %s413_s30, 4  ;;  %s3341_s27 = int_to_ptr.vmem [resolvable:$true] %s1760_s27 }
  0x22   : > { %2108 = vmatpush1.bf16.msra.mxu0 %v2107_v51  ;;  %v1907_v6 = vld [vmem:[%s3383_s2 + $0x180] sm:$0xff]  ;;  %v2115_v8 = vpack.c.bf16 %v1869_v3, %v1867_v2  ;;  %v1872_v12 = vld [vmem:[%s3382_s1 + $0x198] sm:$0x3f]  ;;  %v430_v14 = vld [vmem:[%s3382_s1 + $0x8] sm:$0xff]  ;;  %v515_v20 = vrot.slane %v2730_v10, 1  ;;  %s2387_s26 = scalar_lea.vmem %s3341_s27, 16 }
  0x23   : > { %2156 = vmatpush1.bf16.msra.mxu1 %v2155_v52  ;;  %2110 = vmatprep.subr.bf16.mxu0 %v2109_v53  ;;  %v2727_v9 = vld [vmem:[%s2718_s28] sm:$0xff]  ;;  %v2163_v11 = vpack.c.bf16 %v1907_v6, %v1905_v5  ;;  %v1910_v13 = vld [vmem:[%s3383_s2 + $0x198] sm:$0x3f]  ;;  %v1871_v16 = vld [vmem:[%s3382_s1 + $0x190] sm:$0x3f]  ;;  %p2388_p11 = scmp.ne.s32.totalorder %s3341_s27, %s2387_s26 }
  0x24   : > { %2158 = vmatprep.subr.bf16.mxu1 %v2157_v57  ;;  %v432_v15 = vld [vmem:[%s3382_s1 + $0x18] sm:$0xff]  ;;  %v456_v17 = vld [vmem:[%s3383_s2 + $0x8] sm:$0xff]  ;;  %v514_v19 = vrot.slane %v2727_v9, 1  ;;  %v429_v21 = vld [vmem:[%s3382_s1] sm:$0xff] }
  0x25   : > { %v458_v18 = vld [vmem:[%s3383_s2 + $0x18] sm:$0xff]  ;;  %v431_v22 = vld [vmem:[%s3382_s1 + $0x10] sm:$0xff]  ;;  %v455_v23 = vld [vmem:[%s3383_s2] sm:$0xff]  ;;  %v2117_v24 = vpack.c.bf16 %v432_v15, %v430_v14  ;;  %p2389_p12 = pnand %p2388_p11, %p2558_p5 }
  0x26   : > { %2112 = vmatpush1.bf16.msra.mxu0 %v2111_v63  ;;  %v457_v25 = vld [vmem:[%s3383_s2 + $0x10] sm:$0xff]  ;;  %v434_v26 = vld [vmem:[%s3382_s1 + $0x28] sm:$0xff]  ;;  %v436_v27 = vld [vmem:[%s3382_s1 + $0x38] sm:$0xff]  ;;  %v2165_v29 = vpack.c.bf16 %v458_v18, %v456_v17  ;;  %v516_v32 = vsel %vm513_vm1, %v514_v19, %v515_v20  ;;  %v2119_v33 = vpack.c.bf16 %v431_v22, %v429_v21 }
  0x27   : > { %2160 = vmatpush1.bf16.msra.mxu1 %v2159_v0  ;;  %2114 = vmatprep.subr.bf16.mxu0 %v2113_v1  ;;  %v1909_v28 = vld [vmem:[%s3383_s2 + $0x190] sm:$0x3f]  ;;  %v460_v30 = vld [vmem:[%s3383_s2 + $0x28] sm:$0xff]  ;;  %v462_v31 = vld [vmem:[%s3383_s2 + $0x38] sm:$0xff]  ;;  %v2167_v35 = vpack.c.bf16 %v457_v25, %v455_v23  ;;  %v2121_v36 = vpack.c.bf16 %v436_v27, %v434_v26  ;;  %p2390_p13 = pneg %p2389_p12 }
  0x28   : > { %2162 = vmatprep.subr.bf16.mxu1 %v2161_v4  ;;  %v433_v34 = vld [vmem:[%s3382_s1 + $0x20] sm:$0xff]  ;;  %v435_v37 = vld [vmem:[%s3382_s1 + $0x30] sm:$0xff]  ;;  %v2169_v40 = vpack.c.bf16 %v462_v31, %v460_v30  ;;  %v438_v42 = vld [vmem:[%s3382_s1 + $0x48] sm:$0xff] }
  0x29   : > { %v459_v38 = vld [vmem:[%s3383_s2 + $0x20] sm:$0xff]  ;;  %v2796_v39 = vld [vmem:[%s2718_s28 + $0x10] sm:$0xff]  ;;  %v440_v43 = vld [vmem:[%s3382_s1 + $0x58] sm:$0xff]  ;;  %v2123_v47 = vpack.c.bf16 %v435_v37, %v433_v34 }
  0x2a   : > { %2116 = vmatpush1.bf16.msra.mxu0 %v2115_v8  ;;  %v461_v41 = vld [vmem:[%s3383_s2 + $0x30] sm:$0xff]  ;;  %v517_v44 = vrot.slane %v2796_v39, 1  ;;  %v464_v45 = vld [vmem:[%s3383_s2 + $0x48] sm:$0xff]  ;;  %v466_v46 = vld [vmem:[%s3383_s2 + $0x58] sm:$0xff]  ;;  %v2125_v51 = vpack.c.bf16 %v440_v43, %v438_v42 }
  0x2b   : > { %2164 = vmatpush1.bf16.msra.mxu1 %v2163_v11  ;;  %1873 = vmatprep.subr.msk.mxu0 %vm532_vm0, %v1872_v12  ;;  %v2819_v49 = vld [vmem:[%s2718_s28 + $0x18] sm:$0xff]  ;;  %v2171_v50 = vpack.c.bf16 %v461_v41, %v459_v38  ;;  %v437_v52 = vld [vmem:[%s3382_s1 + $0x40] sm:$0xff]  ;;  %v439_v53 = vld [vmem:[%s3382_s1 + $0x50] sm:$0xff]  ;;  %v2173_v56 = vpack.c.bf16 %v466_v46, %v464_v45 }
  0x2c   : > { %1911 = vmatprep.subr.msk.mxu1 %vm532_vm0, %v1910_v13  ;;  %v518_v48 = vsel %vm513_vm1, %v515_v20, %v517_v44  ;;  %v463_v54 = vld [vmem:[%s3383_s2 + $0x40] sm:$0xff]  ;;  %v519_v55 = vrot.slane %v2819_v49, 1  ;;  %v465_v57 = vld [vmem:[%s3383_s2 + $0x50] sm:$0xff]  ;;  %v442_v58 = vld [vmem:[%s3382_s1 + $0x68] sm:$0xff]  ;;  %v2127_v63 = vpack.c.bf16 %v439_v53, %v437_v52 }
  0x2d   : > { %v444_v59 = vld [vmem:[%s3382_s1 + $0x78] sm:$0xff]  ;;  %v468_v60 = vld [vmem:[%s3383_s2 + $0x68] sm:$0xff]  ;;  %v2850_v62 = vld [vmem:[%s2718_s28 + $0x20] sm:$0x3]  ;;  %v2175_v2 = vpack.c.bf16 %v465_v57, %v463_v54 }
  0x2e   : > { %1874 = vmatpush1.msk.msra.mxu0 %vm532_vm0, %v1871_v16  ;;  %v470_v61 = vld [vmem:[%s3383_s2 + $0x78] sm:$0xff]  ;;  %v520_v0 = vsel %vm513_vm1, %v517_v44, %v519_v55  ;;  %v521_v1 = vrot.slane %v2850_v62, 1  ;;  %v2129_v3 = vpack.c.bf16 %v444_v59, %v442_v58  ;;  %v441_v4 = vld [vmem:[%s3382_s1 + $0x60] sm:$0xff]  ;;  %v443_v5 = vld [vmem:[%s3382_s1 + $0x70] sm:$0xff] }
  0x2f   : > { %1912 = vmatpush1.msk.msra.mxu1 %vm532_vm0, %v1909_v28  ;;  %2118 = vmatprep.subr.bf16.mxu0 %v2117_v24  ;;  %v467_v6 = vld [vmem:[%s3383_s2 + $0x60] sm:$0xff]  ;;  %v2177_v8 = vpack.c.bf16 %v470_v61, %v468_v60  ;;  %v469_v11 = vld [vmem:[%s3383_s2 + $0x70] sm:$0xff]  ;;  %v446_v12 = vld [vmem:[%s3382_s1 + $0x88] sm:$0xff]  ;;  %v2131_v16 = vpack.c.bf16 %v443_v5, %v441_v4 }
  0x30   : > { %2166 = vmatprep.subr.bf16.mxu1 %v2165_v29  ;;  %1875 = vmatmul.mubr.msk.f32.vlgmr.msra.gmra.mrb[0].mxu0 %vm523_vm2, %v516_v32  ;;  %v448_v13 = vld [vmem:[%s3382_s1 + $0x98] sm:$0xff]  ;;  %v472_v14 = vld [vmem:[%s3383_s2 + $0x88] sm:$0xff]  ;;  %v522_v17 = vsel %vm513_vm1, %v519_v55, %v521_v1  ;;  %v2179_v18 = vpack.c.bf16 %v469_v11, %v467_v6  ;;  %v445_v20 = vld [vmem:[%s3382_s1 + $0x80] sm:$0xff] }
  0x31   : > { %2120 = vmatpush1.bf16.msra.mxu0 %v2119_v33  ;;  %1913 = vmatmul.mubr.msk.f32.vlgmr.msra.gmra.mrb[0].mxu1 %vm523_vm2, %v516_v32  ;;  %v474_v15 = vld [vmem:[%s3383_s2 + $0x98] sm:$0xff]  ;;  %v2133_v19 = vpack.c.bf16 %v448_v13, %v446_v12  ;;  %v447_v21 = vld [vmem:[%s3382_s1 + $0x90] sm:$0xff]  ;;  %v471_v22 = vld [vmem:[%s3383_s2 + $0x80] sm:$0xff] }
  0x32   : > { %2168 = vmatpush1.bf16.msra.mxu1 %v2167_v35  ;;  %2122 = vmatprep.subr.bf16.mxu0 %v2121_v36  ;;  %v2181_v23 = vpack.c.bf16 %v474_v15, %v472_v14  ;;  %v473_v24 = vld [vmem:[%s3383_s2 + $0x90] sm:$0xff]  ;;  %v450_v25 = vld [vmem:[%s3382_s1 + $0xa8] sm:$0xff]  ;;  %v452_v26 = vld [vmem:[%s3382_s1 + $0xb8] sm:$0xff]  ;;  %v2135_v29 = vpack.c.bf16 %v447_v21, %v445_v20 }
  0x33   : > { %2170 = vmatprep.subr.bf16.mxu1 %v2169_v40  ;;  %609 = vmatprep.mubr.f32.mxu0 %v2451_v7  ;;  %v476_v27 = vld [vmem:[%s3383_s2 + $0xa8] sm:$0xff]  ;;  %v478_v28 = vld [vmem:[%s3383_s2 + $0xb8] sm:$0xff]  ;;  %v2183_v30 = vpack.c.bf16 %v473_v24, %v471_v22  ;;  %v2137_v31 = vpack.c.bf16 %v452_v26, %v450_v25  ;;  %v449_v32 = vld [vmem:[%s3382_s1 + $0xa0] sm:$0xff] }
  0x34   : > { %834 = vmatprep.mubr.f32.mxu1 %v2451_v7  ;;  %1876 = vmatmul.mubr.msk.f32.gmra.mrb[2].mxu0 %vm523_vm2, %v518_v48  ;;  %v451_v33 = vld [vmem:[%s3382_s1 + $0xb0] sm:$0xff]  ;;  %v2185_v34 = vpack.c.bf16 %v478_v28, %v476_v27  ;;  %v475_v35 = vld [vmem:[%s3383_s2 + $0xa0] sm:$0xff]  ;;  %v454_v40 = vld [vmem:[%s3382_s1 + $0xc8] sm:$0x3f] }
  0x35   : > { %2124 = vmatpush1.bf16.msra.mxu0 %v2123_v47  ;;  %1914 = vmatmul.mubr.msk.f32.gmra.mrb[2].mxu1 %vm523_vm2, %v518_v48  ;;  %v477_v36 = vld [vmem:[%s3383_s2 + $0xb0] sm:$0xff]  ;;  %v2139_v37 = vpack.c.bf16 %v451_v33, %v449_v32  ;;  %v480_v41 = vld [vmem:[%s3383_s2 + $0xc8] sm:$0x3f]  ;;  %v1926_v43 = vld [vmem:[%s3382_s1 + $0x1b8] sm:$0xff] }
  0x36   : > { %2172 = vmatpush1.bf16.msra.mxu1 %v2171_v50  ;;  %2126 = vmatprep.subr.bf16.mxu0 %v2125_v51  ;;  %v2187_v38 = vpack.c.bf16 %v477_v36, %v475_v35  ;;  %v1924_v42 = vld [vmem:[%s3382_s1 + $0x1a8] sm:$0xff]  ;;  %v453_v44 = vld [vmem:[%s3382_s1 + $0xc0] sm:$0x3f]  ;;  %v1958_v46 = vld [vmem:[%s3383_s2 + $0x1b8] sm:$0xff] }
  0x37   : > { %2174 = vmatprep.subr.bf16.mxu1 %v2173_v56  ;;  %615 = vmatprep.mubr.f32.mxu0 %v2451_v7  ;;  %v1956_v45 = vld [vmem:[%s3383_s2 + $0x1a8] sm:$0xff]  ;;  %v1923_v47 = vld [vmem:[%s3382_s1 + $0x1a0] sm:$0xff]  ;;  %v1925_v48 = vld [vmem:[%s3382_s1 + $0x1b0] sm:$0xff]  ;;  %v2189_v51 = vpack.c.bf16 %v1926_v43, %v1924_v42 }
  0x38   : > { %840 = vmatprep.mubr.f32.mxu1 %v2451_v7  ;;  %1877 = vmatmul.mubr.msk.f32.gmra.mrb[4].mxu0 %vm523_vm2, %v520_v0  ;;  %v1955_v50 = vld [vmem:[%s3383_s2 + $0x1a0] sm:$0xff]  ;;  %v1957_v52 = vld [vmem:[%s3383_s2 + $0x1b0] sm:$0xff]  ;;  %v1928_v53 = vld [vmem:[%s3382_s1 + $0x1c8] sm:$0xff]  ;;  %v2213_v56 = vpack.c.bf16 %v1958_v46, %v1956_v45  ;;  %v2191_v59 = vpack.c.bf16 %v1925_v48, %v1923_v47 }
  0x39   : > { %2128 = vmatpush1.bf16.msra.mxu0 %v2127_v63  ;;  %1915 = vmatmul.mubr.msk.f32.gmra.mrb[4].mxu1 %vm523_vm2, %v520_v0  ;;  %v1930_v54 = vld [vmem:[%s3382_s1 + $0x1d8] sm:$0xff]  ;;  %v479_v55 = vld [vmem:[%s3383_s2 + $0xc0] sm:$0x3f]  ;;  %v1960_v57 = vld [vmem:[%s3383_s2 + $0x1c8] sm:$0xff]  ;;  %v2215_v60 = vpack.c.bf16 %v1957_v52, %v1955_v50 }
  0x3a   : > { %2176 = vmatpush1.bf16.msra.mxu1 %v2175_v2  ;;  %2130 = vmatprep.subr.bf16.mxu0 %v2129_v3  ;;  %v1962_v58 = vld [vmem:[%s3383_s2 + $0x1d8] sm:$0xff]  ;;  %v2193_v61 = vpack.c.bf16 %v1930_v54, %v1928_v53  ;;  %v1927_v63 = vld [vmem:[%s3382_s1 + $0x1c0] sm:$0xff]  ;;  %v1929_v0 = vld [vmem:[%s3382_s1 + $0x1d0] sm:$0xff] }
  0x3b   : > { %2178 = vmatprep.subr.bf16.mxu1 %v2177_v8  ;;  %621 = vmatprep.mubr.f32.mxu0 %v2451_v7  ;;  %v1959_v1 = vld [vmem:[%s3383_s2 + $0x1c0] sm:$0xff]  ;;  %v2217_v2 = vpack.c.bf16 %v1962_v58, %v1960_v57  ;;  %v1961_v3 = vld [vmem:[%s3383_s2 + $0x1d0] sm:$0xff]  ;;  %v1932_v4 = vld [vmem:[%s3382_s1 + $0x1e8] sm:$0xff]  ;;  %v2195_v11 = vpack.c.bf16 %v1929_v0, %v1927_v63 }
  0x3c   : > { %846 = vmatprep.mubr.f32.mxu1 %v2451_v7  ;;  %1878 = vmatmul.mubr.msk.f32.gmra.mrb[6].mxu0 %vm523_vm2, %v522_v17  ;;  %v1934_v5 = vld [vmem:[%s3382_s1 + $0x1f8] sm:$0xff]  ;;  %v1964_v6 = vld [vmem:[%s3383_s2 + $0x1e8] sm:$0xff]  ;;  %v2219_v12 = vpack.c.bf16 %v1961_v3, %v1959_v1  ;;  %v1931_v14 = vld [vmem:[%s3382_s1 + $0x1e0] sm:$0xff]  ;;  %v978_v1 = vrot.slane %v2796_v39, 2  ;;  %v980_v3 = vrot.slane %v2819_v49, 2 }
  0x3d   : > { %2132 = vmatpush1.bf16.msra.mxu0 %v2131_v16  ;;  %1916 = vmatmul.mubr.msk.f32.gmra.mrb[6].mxu1 %vm523_vm2, %v522_v17  ;;  %v1966_v8 = vld [vmem:[%s3383_s2 + $0x1f8] sm:$0xff]  ;;  %v2197_v13 = vpack.c.bf16 %v1934_v5, %v1932_v4  ;;  %v1933_v15 = vld [vmem:[%s3382_s1 + $0x1f0] sm:$0xff]  ;;  %v1963_v16 = vld [vmem:[%s3383_s2 + $0x1e0] sm:$0xff]  ;;  %v982_v4 = vrot.slane %v2850_v62, 2  ;;  %v1227_v62 = vlaneseq }
  0x3e   : > { %2180 = vmatpush1.bf16.msra.mxu1 %v2179_v18  ;;  %2134 = vmatprep.subr.bf16.mxu0 %v2133_v19  ;;  %v2221_v17 = vpack.c.bf16 %v1966_v8, %v1964_v6  ;;  %v1965_v18 = vld [vmem:[%s3383_s2 + $0x1f0] sm:$0xff]  ;;  %v1936_v19 = vld [vmem:[%s3382_s1 + $0x208] sm:$0xff]  ;;  %v1938_v20 = vld [vmem:[%s3382_s1 + $0x218] sm:$0xff] }
  0x3f   : > { %2182 = vmatprep.subr.bf16.mxu1 %v2181_v23  ;;  %706 = vmatprep.mubr.f32.mxu0 %v2451_v7  ;;  %v1968_v21 = vld [vmem:[%s3383_s2 + $0x208] sm:$0xff]  ;;  %v1970_v22 = vld [vmem:[%s3383_s2 + $0x218] sm:$0xff]  ;;  %v2199_v23 = vpack.c.bf16 %v1933_v15, %v1931_v14  ;;  %v2223_v24 = vpack.c.bf16 %v1965_v18, %v1963_v16  ;;  %v2201_v25 = vpack.c.bf16 %v1938_v20, %v1936_v19  ;;  %v1935_v26 = vld [vmem:[%s3382_s1 + $0x200] sm:$0xff]  ;;  %v1228_v5 = vshrl.u32 %v1227_v62, 7 }
  0x40   : > { %923 = vmatprep.mubr.f32.mxu1 %v2451_v7  ;;  %v1937_v27 = vld [vmem:[%s3382_s1 + $0x210] sm:$0xff]  ;;  %v1967_v28 = vld [vmem:[%s3383_s2 + $0x200] sm:$0xff]  ;;  %v1942_v32 = vld [vmem:[%s3382_s1 + $0x238] sm:$0xff] }
  0x41   : > { %2136 = vmatpush1.bf16.msra.mxu0 %v2135_v29  ;;  %v2225_v29 = vpack.c.bf16 %v1970_v22, %v1968_v21  ;;  %v1972_v33 = vld [vmem:[%s3383_s2 + $0x228] sm:$0xff]  ;;  %v2203_v35 = vpack.c.bf16 %v1937_v27, %v1935_v26  ;;  %v1973_v43 = vld [vmem:[%s3383_s2 + $0x230] sm:$0xff]  ;;  %v1946_v45 = vld [vmem:[%s3382_s1 + $0x258] sm:$0xff]  ;;  %v1229_v6 = vsub.s32 0, %v1228_v5 }
  0x42   : > { %2184 = vmatpush1.bf16.msra.mxu1 %v2183_v30  ;;  %2138 = vmatprep.subr.bf16.mxu0 %v2137_v31  ;;  %v1969_v30 = vld [vmem:[%s3383_s2 + $0x210] sm:$0xff]  ;;  %v1940_v31 = vld [vmem:[%s3382_s1 + $0x228] sm:$0xff]  ;;  %v1978_v47 = vld [vmem:[%s3383_s2 + $0x258] sm:$0xff] }
  0x43   : > { %2186 = vmatprep.subr.bf16.mxu1 %v2185_v34  ;;  %v1974_v34 = vld [vmem:[%s3383_s2 + $0x238] sm:$0xff]  ;;  %v2227_v36 = vpack.c.bf16 %v1969_v30, %v1967_v28  ;;  %v1976_v46 = vld [vmem:[%s3383_s2 + $0x248] sm:$0xff]  ;;  %v1943_v52 = vld [vmem:[%s3382_s1 + $0x240] sm:$0xff] }
  0x44   : > { %v2229_v42 = vpack.c.bf16 %v1974_v34, %v1972_v33  ;;  %v1945_v53 = vld [vmem:[%s3382_s1 + $0x250] sm:$0xff]  ;;  %v2233_v54 = vpack.c.bf16 %v1978_v47, %v1976_v46  ;;  %v1980_v63 = vld [vmem:[%s3383_s2 + $0x268] sm:$0x3f]  ;;  %v1947_v0 = vld [vmem:[%s3382_s1 + $0x260] sm:$0x3f] }
  0x45   : > { %2140 = vmatpush1.bf16.msra.mxu0 %v2139_v37  ;;  %v2205_v37 = vpack.c.bf16 %v1942_v32, %v1940_v31  ;;  %v2211_v57 = vpack.c.bf16 %v1945_v53, %v1943_v52  ;;  %v1225_v8 = vld [vmem:[%s3384_s3] sm:$0x3] }
  0x46   : > { %2188 = vmatpush1.bf16.msra.mxu1 %v2187_v38  ;;  %1879 = vmatprep.subr.msk.mxu0 %vm532_vm0, %v454_v40  ;;  %v1939_v38 = vld [vmem:[%s3382_s1 + $0x220] sm:$0xff]  ;;  %v1941_v40 = vld [vmem:[%s3382_s1 + $0x230] sm:$0xff] }
  0x47   : > { %1917 = vmatprep.subr.msk.mxu1 %vm532_vm0, %v480_v41  ;;  %v1971_v41 = vld [vmem:[%s3383_s2 + $0x220] sm:$0xff]  ;;  %v2207_v48 = vpack.c.bf16 %v1941_v40, %v1939_v38 }
  0x48   : > { %v2231_v50 = vpack.c.bf16 %v1973_v43, %v1971_v41 }
  0x49   : > { %1880 = vmatpush1.msk.msra.mxu0 %vm532_vm0, %v453_v44  ;;  %v1944_v44 = vld [vmem:[%s3382_s1 + $0x248] sm:$0xff] }
  0x4a   : > { %1918 = vmatpush1.msk.msra.mxu1 %vm532_vm0, %v479_v55  ;;  %2190 = vmatprep.subr.bf16.mxu0 %v2189_v51  ;;  %v2209_v51 = vpack.c.bf16 %v1946_v45, %v1944_v44  ;;  %v1975_v55 = vld [vmem:[%s3383_s2 + $0x240] sm:$0xff] }
  0x4b   : > { %2214 = vmatprep.subr.bf16.mxu1 %v2213_v56  ;;  %1881 = vmatmul.mubr.msk.f32.vlgmr.msra.gmra.mrb[0].mxu0 %vm523_vm2, %v2727_v9  ;;  %v1977_v56 = vld [vmem:[%s3383_s2 + $0x250] sm:$0xff] }
  0x4c   : > { %1919 = vmatmul.mubr.msk.f32.vlgmr.msra.gmra.mrb[0].mxu1 %vm523_vm2, %v2727_v9  ;;  %2192 = vmatpush1.bf16.msra.mxu0 %v2191_v59  ;;  %v2235_v58 = vpack.c.bf16 %v1977_v56, %v1975_v55  ;;  %v1948_v59 = vld [vmem:[%s3382_s1 + $0x268] sm:$0x3f] }
  0x4d   : > { %2216 = vmatpush1.bf16.msra.mxu1 %v2215_v60  ;;  %2194 = vmatprep.subr.bf16.mxu0 %v2193_v61  ;;  %v975_v60 = vrot.slane %v2727_v9, 2  ;;  %v976_v61 = vrot.slane %v2730_v10, 2  ;;  %v1979_v9 = vld [vmem:[%s3383_s2 + $0x260] sm:$0x3f] }
  0x4e   : > { %2218 = vmatprep.subr.bf16.mxu1 %v2217_v2  ;;  %712 = vmatprep.mubr.f32.mxu0 %v2451_v7 }
  0x4f   : > { %929 = vmatprep.mubr.f32.mxu1 %v2451_v7  ;;  %1882 = vmatmul.mubr.msk.f32.gmra.mrb[2].mxu0 %vm523_vm2, %v2730_v10  ;;  %v979_v2 = vsel %vm532_vm0, %v976_v61, %v978_v1 }
  0x50   : > { %2196 = vmatpush1.bf16.msra.mxu0 %v2195_v11  ;;  %1920 = vmatmul.mubr.msk.f32.gmra.mrb[2].mxu1 %vm523_vm2, %v2730_v10  ;;  %v977_v10 = vsel %vm532_vm0, %v975_v60, %v976_v61  ;;  %v1233_v11 = vsub.s32 1, %v1228_v5  ;;  %v1486_v5 = vld [vmem:[%s3387_s6 + $0x80] sm:$0xff] }
  0x51   : > { %2220 = vmatpush1.bf16.msra.mxu1 %v2219_v12  ;;  %2198 = vmatprep.subr.bf16.mxu0 %v2197_v13  ;;  %v1230_v12 = vrot.slane %v1225_v8, %v1229_v6  ;;  %v1487_v6 = vld [vmem:[%s3387_s6 + $0x88] sm:$0xff] }
  0x52   : > { %2222 = vmatprep.subr.bf16.mxu1 %v2221_v17  ;;  %718 = vmatprep.mubr.f32.mxu0 %v2451_v7  ;;  %v1234_v13 = vrot.slane %v1225_v8, %v1233_v11 }
  0x53   : > { %935 = vmatprep.mubr.f32.mxu1 %v2451_v7  ;;  %1883 = vmatmul.mubr.msk.f32.gmra.mrb[4].mxu0 %vm523_vm2, %v2796_v39 }
  0x54   : > { %2200 = vmatpush1.bf16.msra.mxu0 %v2199_v23  ;;  %1921 = vmatmul.mubr.msk.f32.gmra.mrb[4].mxu1 %vm523_vm2, %v2796_v39  ;;  %v981_v39 = vsel %vm532_vm0, %v978_v1, %v980_v3 }
  0x55   : > { %2224 = vmatpush1.bf16.msra.mxu1 %v2223_v24  ;;  %2202 = vmatprep.subr.bf16.mxu0 %v2201_v25 }
  0x56   : > { %2226 = vmatprep.subr.bf16.mxu1 %v2225_v29  ;;  %724 = vmatprep.mubr.f32.mxu0 %v2451_v7 }
  0x57   : > { %941 = vmatprep.mubr.f32.mxu1 %v2451_v7  ;;  %1884 = vmatmul.mubr.msk.f32.gmra.mrb[6].mxu0 %vm523_vm2, %v2819_v49 }
  0x58   : > { %2204 = vmatpush1.bf16.msra.mxu0 %v2203_v35  ;;  %1922 = vmatmul.mubr.msk.f32.gmra.mrb[6].mxu1 %vm523_vm2, %v2819_v49  ;;  %v983_v49 = vsel %vm532_vm0, %v980_v3, %v982_v4 }
  0x59   : > { %2228 = vmatpush1.bf16.msra.mxu1 %v2227_v36  ;;  %2206 = vmatprep.subr.bf16.mxu0 %v2205_v37 }
  0x5a   : > { %2230 = vmatprep.subr.bf16.mxu1 %v2229_v42  ;;  %1062 = vmatprep.mubr.f32.mxu0 %v2451_v7 }
  0x5b   : > { %1192 = vmatprep.mubr.f32.mxu1 %v2451_v7 }
  0x5c   : > { %2208 = vmatpush1.bf16.msra.mxu0 %v2207_v48 }
  0x5d   : > { %2232 = vmatpush1.bf16.msra.mxu1 %v2231_v50  ;;  %2210 = vmatprep.subr.bf16.mxu0 %v2209_v51 }
  0x5e   : > { %2234 = vmatprep.subr.bf16.mxu1 %v2233_v54 }
  0x60   : > { %2212 = vmatpush1.bf16.msra.mxu0 %v2211_v57 }
  0x61   : > { %2236 = vmatpush1.bf16.msra.mxu1 %v2235_v58  ;;  %1949 = vmatprep.subr.msk.mxu0 %vm532_vm0, %v1948_v59 }
  0x62   : > { %1981 = vmatprep.subr.msk.mxu1 %vm532_vm0, %v1980_v63 }
  0x64   : > { %1950 = vmatpush1.msk.msra.mxu0 %vm532_vm0, %v1947_v0 }
  0x65   : > { %1982 = vmatpush1.msk.msra.mxu1 %vm532_vm0, %v1979_v9  ;;  %1951 = vmatmul.mubr.msk.f32.vlgmr.msra.gmra.mrb[0].mxu0 %vm523_vm2, %v977_v10 }
  0x66   : > { %1983 = vmatmul.mubr.msk.f32.vlgmr.msra.gmra.mrb[0].mxu1 %vm523_vm2, %v977_v10  ;;  %1068 = vmatprep.mubr.f32.mxu0 %v2451_v7 }
  0x67   : > { %1198 = vmatprep.mubr.f32.mxu1 %v2451_v7 }
  0x69   : > { %1952 = vmatmul.mubr.msk.f32.gmra.mrb[2].mxu0 %vm523_vm2, %v979_v2 }
  0x6a   : > { %1984 = vmatmul.mubr.msk.f32.gmra.mrb[2].mxu1 %vm523_vm2, %v979_v2  ;;  %1074 = vmatprep.mubr.f32.mxu0 %v2451_v7 }
  0x6b   : > { %1204 = vmatprep.mubr.f32.mxu1 %v2451_v7 }
  0x6d   : > { %1953 = vmatmul.mubr.msk.f32.gmra.mrb[4].mxu0 %vm523_vm2, %v981_v39 }
  0x6e   : > { %1985 = vmatmul.mubr.msk.f32.gmra.mrb[4].mxu1 %vm523_vm2, %v981_v39  ;;  %1080 = vmatprep.mubr.f32.mxu0 %v2451_v7 }
  0x6f   : > { %1210 = vmatprep.mubr.f32.mxu1 %v2451_v7 }
  0x71   : > { %1954 = vmatmul.mubr.msk.f32.gmra.mrb[6].mxu0 %vm523_vm2, %v983_v49 }
  0x72   : > { %1986 = vmatmul.mubr.msk.f32.gmra.mrb[6].mxu1 %vm523_vm2, %v983_v49  ;;  %1350 = vmatprep.mubr.f32.mxu0 %v2451_v7 }
  0x73   : > { %1435 = vmatprep.mubr.f32.mxu1 %v2451_v7 }
 0x138   : > { %v1064_v14 = vpop.f32.mrb[0].mxu0 }
 0x139   : > { %v1237_v15 = vadd.f32 %v1230_v12, %v1064_v14  ;;  %v1194_v16 = vpop.f32.mrb[0].mxu1  ;;  %v1066_v17 = vpop.f32.mrb[1].mxu0  ;;  %v1470_v14 = vld [vmem:[%s3387_s6] sm:$0xff] }
 0x13a   : > { %v1253_v18 = vadd.f32 %v1230_v12, %v1194_v16  ;;  %v1238_v19 = vadd.f32 %v1234_v13, %v1066_v17  ;;  %v1196_v20 = vpop.f32.mrb[1].mxu1  ;;  %v1488_v16 = vld [vmem:[%s3387_s6 + $0x90] sm:$0xff]  ;;  %v1489_v17 = vld [vmem:[%s3387_s6 + $0x98] sm:$0xff] }
 0x13b   : > { %v1245_v21 = vmax.f32 %v1237_v15, 0.0  ;;  %v1254_v22 = vadd.f32 %v1234_v13, %v1196_v20  ;;  %v1471_v15 = vld [vmem:[%s3387_s6 + $0x8] sm:$0xff] }
 0x13c   : > { %v1261_v23 = vmax.f32 %v1253_v18, 0.0  ;;  %v1246_v24 = vmax.f32 %v1238_v19, 0.0  ;;  %v1070_v25 = vpop.f32.mrb[2].mxu0  ;;  %v1277_v18 = vld [vmem:[%s3385_s4] sm:$0xff]  ;;  %v2255_v20 = vpack.c.bf16 %v1471_v15, %v1470_v14 }
 0x13d   : > { %v1262_v26 = vmax.f32 %v1254_v22, 0.0  ;;  %v1239_v27 = vadd.f32 %v1230_v12, %v1070_v25  ;;  %v1200_v28 = vpop.f32.mrb[2].mxu1  ;;  %v1072_v29 = vpop.f32.mrb[3].mxu0  ;;  %v1363_v19 = vld [vmem:[%s3386_s5] sm:$0xff]  ;;  %v1472_v22 = vld [vmem:[%s3387_s6 + $0x10] sm:$0xff]  ;;  %v1491_v25 = vld [vmem:[%s3387_s6 + $0xa8] sm:$0xff] }
 0x13e   : > { %v1269_v30 = vmax.f32 %v1245_v21, %v1261_v23  ;;  %v1255_v31 = vadd.f32 %v1230_v12, %v1200_v28  ;;  %v1240_v32 = vadd.f32 %v1234_v13, %v1072_v29  ;;  %v1202_v33 = vpop.f32.mrb[3].mxu1  ;;  %v2257_v21 = vpack.c.bf16 %v1489_v17, %v1488_v16  ;;  %v1473_v23 = vld [vmem:[%s3387_s6 + $0x18] sm:$0xff] }
 0x13f   : > { %v1270_v34 = vmax.f32 %v1246_v24, %v1262_v26  ;;  %v1247_v35 = vmax.f32 %v1239_v27, 0.0  ;;  %v1256_v36 = vadd.f32 %v1234_v13, %v1202_v33  ;;  %v1490_v24 = vld [vmem:[%s3387_s6 + $0xa0] sm:$0xff]  ;;  %v1278_v26 = vld [vmem:[%s3385_s4 + $0x8] sm:$0xff]  ;;  %v2259_v28 = vpack.c.bf16 %v1473_v23, %v1472_v22  ;;  %v1492_v33 = vld [vmem:[%s3387_s6 + $0xb0] sm:$0xff] }
 0x140   : > { %v1263_v37 = vmax.f32 %v1255_v31, 0.0  ;;  %v1248_v38 = vmax.f32 %v1240_v32, 0.0  ;;  %v1076_v40 = vpop.f32.mrb[4].mxu0  ;;  %v1364_v27 = vld [vmem:[%s3386_s5 + $0x8] sm:$0xff]  ;;  %v2261_v29 = vpack.c.bf16 %v1491_v25, %v1490_v24 }
 0x141   : > { %v1264_v41 = vmax.f32 %v1256_v36, 0.0  ;;  %v1241_v42 = vadd.f32 %v1230_v12, %v1076_v40  ;;  %v1206_v43 = vpop.f32.mrb[4].mxu1  ;;  %v1078_v44 = vpop.f32.mrb[5].mxu0  ;;  %v1475_v31 = vld [vmem:[%s3387_s6 + $0x28] sm:$0xff]  ;;  %v1476_v36 = vld [vmem:[%s3387_s6 + $0x30] sm:$0xff]  ;;  %v1494_v40 = vld [vmem:[%s3387_s6 + $0xc0] sm:$0xff] }
 0x142   : > { %v1271_v45 = vmax.f32 %v1247_v35, %v1263_v37  ;;  %v1257_v46 = vadd.f32 %v1230_v12, %v1206_v43  ;;  %v1242_v47 = vadd.f32 %v1234_v13, %v1078_v44  ;;  %v1208_v48 = vpop.f32.mrb[5].mxu1  ;;  %v1477_v37 = vld [vmem:[%s3387_s6 + $0x38] sm:$0xff]  ;;  %v1478_v43 = vld [vmem:[%s3387_s6 + $0x40] sm:$0xff]  ;;  %v1479_v44 = vld [vmem:[%s3387_s6 + $0x48] sm:$0xff] }
 0x143   : > { %v1272_v50 = vmax.f32 %v1248_v38, %v1264_v41  ;;  %v1249_v51 = vmax.f32 %v1241_v42, 0.0  ;;  %v1258_v52 = vadd.f32 %v1234_v13, %v1208_v48  ;;  %v2267_v38 = vpack.c.bf16 %v1477_v37, %v1476_v36  ;;  %v1495_v41 = vld [vmem:[%s3387_s6 + $0xc8] sm:$0xff] }
 0x144   : > { %v2239_v53 = vpack.c.bf16 %v1271_v45, %v1269_v30  ;;  %v1265_v54 = vmax.f32 %v1257_v46, 0.0  ;;  %v1250_v55 = vmax.f32 %v1242_v47, 0.0  ;;  %v1082_v56 = vpop.f32.mrb[6].mxu0  ;;  %v1474_v30 = vld [vmem:[%s3387_s6 + $0x20] sm:$0xff]  ;;  %v2269_v42 = vpack.c.bf16 %v1495_v41, %v1494_v40  ;;  %v1496_v46 = vld [vmem:[%s3387_s6 + $0xd0] sm:$0xff]  ;;  %v1497_v47 = vld [vmem:[%s3387_s6 + $0xd8] sm:$0xff] }
 0x145   : > { %v1266_v57 = vmax.f32 %v1258_v52, 0.0  ;;  %v1243_v58 = vadd.f32 %v1230_v12, %v1082_v56  ;;  %v1212_v59 = vpop.f32.mrb[6].mxu1  ;;  %v1084_v60 = vpop.f32.mrb[7].mxu0  ;;  %v2237_v61 = vpack.c.bf16 %v1272_v50, %v1270_v34  ;;  %v2263_v32 = vpack.c.bf16 %v1475_v31, %v1474_v30  ;;  %v1493_v34 = vld [vmem:[%s3387_s6 + $0xb8] sm:$0xff]  ;;  %v1480_v50 = vld [vmem:[%s3387_s6 + $0x50] sm:$0xff]  ;;  %v1482_v56 = vld [vmem:[%s3387_s6 + $0x60] sm:$0xff] }
 0x146   : > { %v1273_v63 = vmax.f32 %v1249_v51, %v1265_v54  ;;  %v1259_v0 = vadd.f32 %v1230_v12, %v1212_v59  ;;  %v1244_v9 = vadd.f32 %v1234_v13, %v1084_v60  ;;  %v1214_v10 = vpop.f32.mrb[7].mxu1  ;;  %v2265_v35 = vpack.c.bf16 %v1493_v34, %v1492_v33  ;;  %v1481_v51 = vld [vmem:[%s3387_s6 + $0x58] sm:$0xff]  ;;  %v1499_v54 = vld [vmem:[%s3387_s6 + $0xe8] sm:$0xff]  ;;  %v1500_v59 = vld [vmem:[%s3387_s6 + $0xf0] sm:$0xff] }
 0x147   : > { %v1274_v1 = vmax.f32 %v1250_v55, %v1266_v57  ;;  %v1251_v2 = vmax.f32 %v1243_v58, 0.0  ;;  %v1260_v3 = vadd.f32 %v1234_v13, %v1214_v10  ;;  %2238 = vmatprep.subr.bf16.mxu0 %v2237_v61  ;;  %2246 = vmatprep.subr.bf16.mxu1 %v2237_v61  ;;  %v2253_v13 = vpack.c.bf16 %v1487_v6, %v1486_v5  ;;  %v1483_v57 = vld [vmem:[%s3387_s6 + $0x68] sm:$0xff]  ;;  %v1501_v60 = vld [vmem:[%s3387_s6 + $0xf8] sm:$0xff]  ;;  %v1650_v30 = vld [vmem:[%s3390_s9] sm:$0xff] }
 0x148   : > { %v1267_v39 = vmax.f32 %v1259_v0, 0.0  ;;  %v1252_v4 = vmax.f32 %v1244_v9, 0.0  ;;  %2240 = vmatpush1.bf16.msra.mxu0 %v2239_v53  ;;  %2248 = vmatpush1.bf16.msra.mxu1 %v2239_v53  ;;  %v2271_v45 = vpack.c.bf16 %v1479_v44, %v1478_v43  ;;  %v2273_v48 = vpack.c.bf16 %v1497_v47, %v1496_v46  ;;  %v1498_v53 = vld [vmem:[%s3387_s6 + $0xe0] sm:$0xff]  ;;  %v1485_v0 = vld [vmem:[%s3387_s6 + $0x78] sm:$0xff]  ;;  %v1651_v31 = vld [vmem:[%s3390_s9 + $0x8] sm:$0xff] }
 0x149   : > { %v1268_v49 = vmax.f32 %v1260_v3, 0.0  ;;  %v2275_v52 = vpack.c.bf16 %v1481_v51, %v1480_v50  ;;  %v2277_v55 = vpack.c.bf16 %v1499_v54, %v1498_v53  ;;  %v2279_v58 = vpack.c.bf16 %v1483_v57, %v1482_v56  ;;  %v1653_v34 = vld [vmem:[%s3390_s9 + $0x18] sm:$0xff]  ;;  %v1655_v36 = vld [vmem:[%s3390_s9 + $0x28] sm:$0xff] }
 0x14a   : > { %v1275_v62 = vmax.f32 %v1251_v2, %v1267_v39  ;;  %v2281_v61 = vpack.c.bf16 %v1501_v60, %v1500_v59  ;;  %v2289_v33 = vpack.c.bf16 %v1651_v31, %v1650_v30  ;;  %v1657_v40 = vld [vmem:[%s3390_s9 + $0x38] sm:$0xff]  ;;  %v1659_v43 = vld [vmem:[%s3390_s9 + $0x48] sm:$0xff] }
 0x14b   : > { %v1276_v8 = vmax.f32 %v1252_v4, %v1268_v49  ;;  %v1661_v46 = vld [vmem:[%s3390_s9 + $0x58] sm:$0xff]  ;;  %v1663_v50 = vld [vmem:[%s3390_s9 + $0x68] sm:$0xff] }
 0x14c   : > { %v2243_v11 = vpack.c.bf16 %v1275_v62, %v1273_v63  ;;  %v1484_v63 = vld [vmem:[%s3387_s6 + $0x70] sm:$0xff]  ;;  %v1665_v56 = vld [vmem:[%s3390_s9 + $0x78] sm:$0xff] }
 0x14d   : > { %v2241_v12 = vpack.c.bf16 %v1276_v8, %v1274_v1  ;;  %v2283_v9 = vpack.c.bf16 %v1485_v0, %v1484_v63  ;;  %v1666_v0 = vld [vmem:[%s3391_s10] sm:$0x1] }
 0x14f   : > { %2242 = vmatprep.subr.bf16.mxu0 %v2241_v12  ;;  %2250 = vmatprep.subr.bf16.mxu1 %v2241_v12 }
 0x150   : > { %2244 = vmatpush1.bf16.msra.mxu0 %v2243_v11  ;;  %2252 = vmatpush1.bf16.msra.mxu1 %v2243_v11 }
 0x151   : > { %2254 = vmatprep.subr.bf16.mxu0 %v2253_v13 }
 0x153   : > { %1987 = vmatmul.mubr.msk.f32.vlgmr.msra.gmra.mrb[8].mxu0 %vm1279_vm3, %v1277_v18  ;;  %1989 = vmatmul.mubr.msk.f32.vlgmr.msra.gmra.mrb[8].mxu1 %vm1279_vm3, %v1363_v19 }
 0x154   : > { %1356 = vmatprep.mubr.f32.mxu0 %v2451_v7  ;;  %1441 = vmatprep.mubr.f32.mxu1 %v2451_v7 }
 0x155   : > { %2256 = vmatpush3.bf16.msra.mxu0 %v2255_v20 }
 0x156   : > { %2258 = vmatprep.subr.bf16.mxu0 %v2257_v21 }
 0x157   : > { %1988 = vmatmul.mubr.msk.f32.gmra.mrb[10].mxu0 %vm1279_vm3, %v1278_v26  ;;  %1990 = vmatmul.mubr.msk.f32.gmra.mrb[10].mxu1 %vm1279_vm3, %v1364_v27  ;;  %v1572_v26 = vld [vmem:[%s3388_s7] sm:$0xff]  ;;  %v1573_v27 = vld [vmem:[%s3388_s7 + $0x8] sm:$0xff] }
 0x158   : > { %2090 = vmatprep.mubr.msk.f32.mxu1 %vm2453_vm4, %v2451_v7 }
 0x159   : > { %2260 = vmatpush3.bf16.msra.mxu0 %v2259_v28  ;;  %v2286_v28 = vpack.c.bf16 %v1573_v27, %v1572_v26 }
 0x15a   : > { %2262 = vmatprep.subr.bf16.mxu0 %v2261_v29  ;;  %v2452_v29 = vmov 0.0|0.0  }
 0x15b   : > { %2288 = vmatprep.subr.bf16.mxu1 %v2452_v29 }
 0x15c   : > { %2290 = vmatpush3.bf16.msra.mxu1 %v2289_v33 }
 0x15d   : > { %2264 = vmatpush3.bf16.msra.mxu0 %v2263_v32  ;;  %v1652_v32 = vld [vmem:[%s3390_s9 + $0x10] sm:$0xff]  ;;  %2291 = vmatprep.subr.bf16.mxu1 %v2452_v29 }
 0x15e   : > { %2266 = vmatprep.subr.bf16.mxu0 %v2265_v35  ;;  %v2292_v35 = vpack.c.bf16 %v1653_v34, %v1652_v32 }
 0x160   : > { %2293 = vmatpush3.bf16.msra.mxu1 %v2292_v35 }
 0x161   : > { %2268 = vmatpush3.bf16.msra.mxu0 %v2267_v38  ;;  %2294 = vmatprep.subr.bf16.mxu1 %v2452_v29  ;;  %v1656_v38 = vld [vmem:[%s3390_s9 + $0x30] sm:$0xff] }
 0x162   : > { %2270 = vmatprep.subr.bf16.mxu0 %v2269_v42  ;;  %v2298_v41 = vpack.c.bf16 %v1657_v40, %v1656_v38  ;;  %v1658_v42 = vld [vmem:[%s3390_s9 + $0x40] sm:$0xff] }
 0x163   : > { %v2301_v44 = vpack.c.bf16 %v1659_v43, %v1658_v42 }
 0x165   : > { %2272 = vmatpush3.bf16.msra.mxu0 %v2271_v45  ;;  %v1660_v45 = vld [vmem:[%s3390_s9 + $0x50] sm:$0xff] }
 0x166   : > { %2274 = vmatprep.subr.bf16.mxu0 %v2273_v48  ;;  %v2304_v47 = vpack.c.bf16 %v1661_v46, %v1660_v45  ;;  %v1662_v48 = vld [vmem:[%s3390_s9 + $0x60] sm:$0xff] }
 0x167   : > { %v2307_v51 = vpack.c.bf16 %v1663_v50, %v1662_v48 }
 0x169   : > { %2276 = vmatpush3.bf16.msra.mxu0 %v2275_v52 }
 0x16a   : > { %2278 = vmatprep.subr.bf16.mxu0 %v2277_v55  ;;  %v1664_v55 = vld [vmem:[%s3390_s9 + $0x70] sm:$0xff] }
 0x16b   : > { %v2310_v57 = vpack.c.bf16 %v1665_v56, %v1664_v55 }
 0x16d   : > { %2280 = vmatpush3.bf16.msra.mxu0 %v2279_v58  ;;  %v1574_v58 = vld [vmem:[%s3389_s8] sm:$0x1] }
 0x16e   : > { %2282 = vmatprep.subr.bf16.mxu0 %v2281_v61 }
 0x171   : > { %2284 = vmatpush3.bf16.msra.mxu0 %v2283_v9 }
 0x172   : > { %2285 = vmatprep.subr.bf16.mxu0 %v2452_v29 }
 0x226   : > { %v1352_v10 = vpop.f32.mrb[8].mxu0  ;;  %v1437_v1 = vpop.f32.mrb[8].mxu1 }
 0x227   : > { %v1448_v2 = vmax.f32 %v1352_v10, %v1437_v1  ;;  %v1354_v3 = vpop.f32.mrb[9].mxu0  ;;  %v1439_v39 = vpop.f32.mrb[9].mxu1 }
 0x228   : > { %v1449_v4 = vmax.f32 %v1354_v3, %v1439_v39 }
 0x229   : > { %1452 = vst [vmem:[%s423_s17] sm:$0xff] %v1448_v2 }
 0x22a   : > { %1453 = vst [vmem:[%s423_s17 + $0x8] sm:$0xff] %v1449_v4  ;;  %v1358_v49 = vpop.f32.mrb[10].mxu0  ;;  %v1443_v62 = vpop.f32.mrb[10].mxu1 }
 0x22b   : > { %v1450_v5 = vmax.f32 %v1358_v49, %v1443_v62  ;;  %v1360_v6 = vpop.f32.mrb[11].mxu0  ;;  %v1445_v8 = vpop.f32.mrb[11].mxu1 }
 0x22c   : > { %v1451_v11 = vmax.f32 %v1360_v6, %v1445_v8 }
 0x22d   : > { %1454 = vst [vmem:[%s423_s17 + $0x10] sm:$0xff] %v1450_v5  ;;  %v1456_v12 = vadd.f32 %v1450_v5, %v1448_v2 }
 0x22e   : > { %1455 = vst [vmem:[%s423_s17 + $0x18] sm:$0xff] %v1451_v11  ;;  %v1463_v13 = vadd.f32 %v1451_v11, %v1449_v4  ;;  %s1992_s17 = sshll.u32 %s2541_s25, 4  ;;  %s2454_s25 = smov [#allocation2]  }
 0x22f   : > { %v1457_v14 = vrot.slane %v1456_v12, 4  ;;  %s3339_s20 = scalar_lea.hbm %s3393_s12, %s1992_s17  ;;  %s2391_s29 = sshll.u32 %s2454_s25, 4  ;;  %s2392_s29 = int_to_ptr.vmem [resolvable:$false] %s2391_s29 }
 0x230   : > { %v1464_v15 = vrot.slane %v1463_v13, 4  ;;  %s2393_s15 = scalar_lea.vmem %s2392_s29, 32  ;;  %p2394_p0 = scmp.lt.s32.totalorder %s3341_s27, %s2392_s29 }
 0x231   : > { %v1458_v16 = vadd.f32 %v1457_v14, %v1456_v12  ;;  %p2395_p1 = scmp.lt.s32.totalorder %s2393_s15, %s2387_s26 }
 0x232   : > { %v1465_v17 = vadd.f32 %v1464_v15, %v1463_v13 }
 0x233   : > { %v1459_v18 = vrot.slane %v1458_v16, 2  ;;  %p2396_p2 = por %p2395_p1, %p2394_p0 }
 0x234   : > { %v1466_v19 = vrot.slane %v1465_v17, 2 }
 0x235   : > { %v1460_v20 = vadd.f32 %v1459_v18, %v1458_v16  ;;  %p2397_p3 = pnand %p2396_p2, %p2390_p13 }
 0x236   : > { %v1467_v21 = vadd.f32 %v1466_v19, %v1465_v17 }
 0x237   : > { %v1461_v22 = vrot.slane %v1460_v20, 1 }
 0x238   : > { %v1468_v23 = vrot.slane %v1467_v21, 1 }
 0x239   : > { %v1462_v25 = vadd.f32 %v1461_v22, %v1460_v20 }
 0x23a   : > { %v1469_v24 = vadd.f32 %v1468_v23, %v1467_v21 }
 0x23c   : > { %1566 = vmatprep.mubr.f32.mxu0 %v1469_v24 }
 0x23d   : > { %1567 = vmatmul.mubr.f32.vlgmr.msra.gmra.mrb[12].mxu0 %v1462_v25 }
 0x23e   : > { %2287 = vmatpush3.bf16.msra.mxu0 %v2286_v28  ;;  %2055 = vmatprep.mubr.msk.f32.mxu0 %vm2453_vm4, %v2451_v7  ;;  %v1654_v7 = vld [vmem:[%s3390_s9 + $0x20] sm:$0xff] }
 0x23f   : > { %v2295_v37 = vpack.c.bf16 %v1655_v36, %v1654_v7 }
 0x241   : > { %2296 = vmatpush3.bf16.msra.mxu1 %v2295_v37 }
 0x242   : > { %2297 = vmatprep.subr.bf16.mxu1 %v2452_v29 }
 0x245   : > { %2299 = vmatpush3.bf16.msra.mxu1 %v2298_v41 }
 0x246   : > { %2300 = vmatprep.subr.bf16.mxu1 %v2452_v29 }
 0x249   : > { %2302 = vmatpush3.bf16.msra.mxu1 %v2301_v44 }
 0x24a   : > { %2303 = vmatprep.subr.bf16.mxu1 %v2452_v29 }
 0x24d   : > { %2305 = vmatpush3.bf16.msra.mxu1 %v2304_v47 }
 0x24e   : > { %2306 = vmatprep.subr.bf16.mxu1 %v2452_v29 }
 0x251   : > { %2308 = vmatpush3.bf16.msra.mxu1 %v2307_v51 }
 0x252   : > { %2309 = vmatprep.subr.bf16.mxu1 %v2452_v29 }
 0x255   : > { %2311 = vmatpush3.bf16.msra.mxu1 %v2310_v57 }
 0x310   : > { %v2028_v52 = vpop.f32.mrb[12].mxu0 }
 0x311   : > { %v2029_v53 = vpop.f32.mrb[13].mxu0 }
 0x312   : > { %v2030_v54 = vadd.f32 %v2029_v53, %v2028_v52 }
 0x314   : > { %2056 = vmatmul.mubr.msk.f32.vlgmr.msra.gmra.mrb[14].mxu0 %vm1575_vm5, %v2030_v54 }
 0x3e7   : > { %v1645_v59 = vpop.f32.mrb[14].mxu0 }
 0x3e8   : > { %v1646_v60 = vadd.f32 %v1645_v59, %v1574_v58  ;;  %v2057_v61 = vpop.f32.mrb[15].mxu0 }
 0x3ea   : > { %v1649_v63 = vmax.f32 %v1646_v60, 0.0 }
 0x3ec   : > { %2091 = vmatmul.mubr.f32.vlgmr.msra.gmra.mrb[12].mxu1 %v1649_v63 }
 0x4bf   : > { %v1733_v9 = vpop.f32.mrb[12].mxu1 }
 0x4c0   : > { %v1734_v10 = vadd.f32 %v1733_v9, %v1666_v0  ;;  %v2092_v1 = vpop.f32.mrb[13].mxu1 }
 0x4c2   : > { %1738 = vst.msk [vmem:[%s413_s30] sm:$0x1] %vm1737_vm6, %v1734_v10 }
 0x4c3   : > { %2400 = shalt.err (!%p2397_p3)
}
 0x4c4   : > { %s2401_s28 = scalar_lea.hbm %s3339_s20, 16  ;;  %s2405_s16 = scalar_lea.hbm %s3393_s12, 32 }
 0x4c5   : > { %p2402_p4 = scmp.ne.s32.totalorder %s3339_s20, %s2401_s28  ;;  %p2406_p9 = scmp.lt.u32.totalorder %s3339_s20, %s3393_s12 }
 0x4c6   : > { %p2407_p10 = scmp.lt.u32.totalorder %s2405_s16, %s2401_s28  ;;  %p2409_p12 = scmp.lt.u32.totalorder %s2401_s28, %s3339_s20 }
 0x4c7   : > { %p2403_p7 = pnand %p2402_p4, %p2558_p5 }
 0x4c8   : > { %p2408_p11 = por %p2407_p10, %p2406_p9 }
 0x4c9   : > { %p2404_p8 = pneg %p2403_p7 }
 0x4ca   : > { %p2410_p13 = por %p2409_p12, %p2408_p11 }
 0x4cc   : > { %p2411_p0 = pnand %p2410_p13, %p2404_p8 }
 0x4ce   : > { %2414 = shalt.err (!%p2411_p0)
}
 0x4cf   : > { %2345 = dma.vmem_to_hbm [thread:$0]  (%p2558_p5), %s3341_s27, 16, %s3339_s20, %s1745_s23  }
 0x4d0 PF: > { %p2351_p1 = scmp.ge.s32.totalorder %s2449_s24, 2  ;;  %s1780_s19 = sand.u32 1, %s2437_s21  }
 0x4d1   : > { %s1781_s26 = scalar_lea.sflag [#allocation3], %s1780_s19 }
 0x4d2   : > { %p2348_p2 = pnand %p2351_p1, %p2562_p6 }
 0x4d4   : > { %2432 = dma.done.wait (!%p2348_p2), %s1781_s26, 16  }
 0x4d5   : > { %2434 = vsyncadd (!%p2348_p2), %s1781_s26, 4294967280  ;;  %s3407_s24 = sld [smem:[#allocation6_spill]]  ;;  %s3408_s25 = sld [smem:[#allocation5_spill]] }
 0x4d6   : > { %s3409_s23 = sld [smem:[#allocation7_spill]]  ;;  %s3410_s21 = smov %s2441_s22 }
 0x4db   : > { %p23_p3 = scmp.ge.s32.totalorder %s3407_s24, 4   ;;  %s3411_s22 = smov %s3408_s25 }
 0x4dd   :  { %25 = sbr.rel (!%p23_p3) target bundleno = 5 (0x5), region = 115 }
 0x4e4   :  { %1785 = vsyncpa [#allocation3], 1 }
 0x4e5   :  { %1787 = vsyncpa [#allocation3 + $0x1], 1 }

</bundles_post_ra>
